<compile_context>
chip_gen: v7x
topology: tpu7x:2x2x1
jax: 0.10.0
libtpu: 0.0.40
codegen_flags: <defaults>
</compile_context>

<pallas_src>
from functools import partial

import jax
import jax.numpy as jnp
from jax.experimental import pallas as pl
from jax.experimental.pallas import tpu as pltpu


def _sigmoid_via_tanh(x):
    # sigmoid(x) == 0.5 * tanh(0.5 * x) + 0.5 : one EUP op + two VPU ops,
    # instead of exp + divide (2+ EUP pushes) in jax.nn.sigmoid.
    return 0.5 * jnp.tanh(0.5 * x) + 0.5


def lstm_recurrence_kernel(gx_ref, whh_ref, h_out_ref, h_ref, c_ref,
                           *, t_chunk, h_pad, unroll):
    """Sequential LSTM cell over one time chunk.

    Grid = (batch_blocks [parallel], time_chunks [arbitrary/sequential]).
      gx_ref : (t_chunk, B_blk, 4*H_pad) bf16   precomputed x_t W_ih^T + b
      whh_ref: (H_pad, 4*H_pad)          bf16   recurrent weight (gate-major lanes)
      h_out  : (t_chunk, B_blk, H_pad)   f32    hidden states
      h_ref/c_ref: (B_blk, H_pad)        f32    carries (scratch, persist over grid)
    """
    @pl.when(pl.program_id(1) == 0)
    def _():
        h_ref[...] = jnp.zeros_like(h_ref)
        c_ref[...] = jnp.zeros_like(c_ref)

    w = whh_ref[...]                      # (H_pad, 4*H_pad) bf16, resident

    def body(lt, carry):
        h, c = carry                      # f32 (B_blk, H_pad)
        # One fused MXU matmul per step (f32 accumulate), bf16 operands.
        gates = (jnp.dot(h.astype(w.dtype), w,
                         preferred_element_type=jnp.float32)
                 + gx_ref[lt].astype(jnp.float32))        # (B_blk, 4*H_pad)
        # PyTorch LSTM gate order i, f, g, o; slices are 128-aligned lanes.
        i_g = _sigmoid_via_tanh(gates[:, 0 * h_pad:1 * h_pad])
        f_g = _sigmoid_via_tanh(gates[:, 1 * h_pad:2 * h_pad])
        g_g = jnp.tanh(gates[:, 2 * h_pad:3 * h_pad])
        o_g = _sigmoid_via_tanh(gates[:, 3 * h_pad:4 * h_pad])
        c_new = f_g * c + i_g * g_g
        h_new = o_g * jnp.tanh(c_new)
        h_out_ref[lt] = h_new                              # lane-dense store
        return h_new, c_new

    # Partial unroll keeps the LLO scheduling window (MXU/EUP/VPU overlap)
    # without blowing up vreg live ranges at large t_chunk.
    h_fin, c_fin = jax.lax.fori_loop(0, t_chunk, body,
                                     (h_ref[...], c_ref[...]), unroll=unroll)
    h_ref[...] = h_fin
    c_ref[...] = c_fin


def textgen_rnn_forward(x, params, *, t_chunk=32):
    """x: (B, T) int32 token ids -> (B, T, V) float32 logits."""
    emb_table = params["emb"]           # (V, E)   (row pad_idx zeroed)
    w_ih = params["w_ih"]               # (E, 4H)  = weight_ih_l0^T
    w_hh = params["w_hh"]               # (H, 4H)  = weight_hh_l0^T
    b = params["b"]                     # (1, 4H)  = b_ih + b_hh
    w_cls = params["w_cls"]             # (H, V)   = classifier.weight^T
    b_cls = params["b_cls"]             # (1, V)

    B, T = x.shape
    V, E = emb_table.shape
    H = w_hh.shape[0]

    # ---- lane-dense padding of the hidden dim (H -> multiple of 128) -------
    H_pad = ((H + 127) // 128) * 128

    # ---- batch padding / optional megacore batch split (v7x: 2 TCs) --------
    split_batch = B > 8
    b_mult = 16 if split_batch else 8
    n_batch_blocks = 2 if split_batch else 1
    B_pad = ((B + b_mult - 1) // b_mult) * b_mult
    B_blk = B_pad // n_batch_blocks

    # ---- time chunking (don't over-pad tiny sequences) ---------------------
    t_chunk = max(1, min(t_chunk, ((T + 7) // 8) * 8))
    T_pad = ((T + t_chunk - 1) // t_chunk) * t_chunk
    n_chunks = T_pad // t_chunk
    unroll = min(8, t_chunk)

    # ---- hoisted input projection: one big matmul over all B*T tokens ------
    # Kernel layout (T, B, 4*H_pad) is produced directly by the einsum; no
    # separate transpose pass over the largest intermediate.
    emb = jnp.take(emb_table, x, axis=0)                    # (B, T, E)
    w_ih_r = w_ih.reshape(E, 4, H)
    b_r = b.reshape(4, H)
    if H_pad != H:
        w_ih_r = jnp.pad(w_ih_r, ((0, 0), (0, 0), (0, H_pad - H)))
        b_r = jnp.pad(b_r, ((0, 0), (0, H_pad - H)))
    gx = jnp.einsum('bte,egh->tbgh', emb, w_ih_r) + b_r[None, None]
    gx = gx.reshape(T, B, 4 * H_pad).astype(jnp.bfloat16)   # bf16 HBM stream
    gx = jnp.pad(gx, ((0, T_pad - T), (0, B_pad - B), (0, 0)))
    # (Zero pads are safe: padded batch rows / hidden cols stay exactly 0 in
    #  h and c, and trailing time chunks are causal garbage we slice off.)

    # ---- recurrent weight: (H_pad, 4*H_pad) bf16, gate-major lanes ---------
    w_hh_p = w_hh.reshape(H, 4, H)
    if H_pad != H:
        w_hh_p = jnp.pad(w_hh_p, ((0, H_pad - H), (0, 0), (0, H_pad - H)))
    w_hh_p = w_hh_p.reshape(H_pad, 4 * H_pad).astype(jnp.bfloat16)

    # ---- VMEM budget (double-buffered blocks + scratch), with headroom -----
    gates_blk = t_chunk * B_blk * 4 * H_pad * 2       # bf16
    w_blk = H_pad * 4 * H_pad * 2                     # bf16
    out_blk = t_chunk * B_blk * H_pad * 4             # f32
    scratch_b = 2 * B_blk * H_pad * 4                 # f32 h/c carries
    vmem_need = 2 * gates_blk + 2 * w_blk + 2 * out_blk + scratch_b
    vmem_limit = int(min(64 * 2**20, max(2 * vmem_need, 16 * 2**20)))

    kernel = partial(lstm_recurrence_kernel,
                     t_chunk=t_chunk, h_pad=H_pad, unroll=unroll)

    hs_tm = pl.pallas_call(
        kernel,
        out_shape=jax.ShapeDtypeStruct((T_pad, B_pad, H_pad), jnp.float32),
        grid_spec=pltpu.PrefetchScalarGridSpec(
            num_scalar_prefetch=0,
            grid=(n_batch_blocks, n_chunks),
            in_specs=[
                # (t_chunk, B_blk, 4*H_pad) slab of precomputed input gates
                pl.BlockSpec((t_chunk, B_blk, 4 * H_pad),
                             lambda bb, s: (s, bb, 0)),
                # W_hh: constant block index across the whole grid
                pl.BlockSpec((H_pad, 4 * H_pad), lambda bb, s: (0, 0)),
            ],
            out_specs=pl.BlockSpec((t_chunk, B_blk, H_pad),
                                   lambda bb, s: (s, bb, 0)),
            scratch_shapes=[pltpu.VMEM((B_blk, H_pad), jnp.float32),   # h
                            pltpu.VMEM((B_blk, H_pad), jnp.float32)],  # c
        ),
        compiler_params=pltpu.CompilerParams(
            dimension_semantics=("parallel", "arbitrary"),
            vmem_limit_bytes=vmem_limit),
    )(gx, w_hh_p)

    hs = hs_tm[:T, :B, :H]                                   # (T, B, H)
    # ---- hoisted classifier: one (T*B, H) x (H, V) matmul, emits (B, T, V) -
    logits = jnp.einsum('tbh,hv->btv', hs, w_cls) + b_cls
    return logits


def make_params(key, vocab_size, emb_dim, hidden_size, pad_idx=0):
    """Deterministic init mirroring the PyTorch module's parameter shapes."""
    k1, k2, k3, k4, k5, k6, k7 = jax.random.split(key, 7)
    k = 1.0 / jnp.sqrt(hidden_size)

    emb = jax.random.normal(k1, (vocab_size, emb_dim), jnp.float32)
    emb = emb.at[pad_idx].set(0.0)   # padding_idx row is zero

    # nn.LSTM stores weight_ih_l0 (4H, E); we keep transposed (E, 4H).
    w_ih = jax.random.uniform(k2, (emb_dim, 4 * hidden_size), jnp.float32, -k, k)
    w_hh = jax.random.uniform(k3, (hidden_size, 4 * hidden_size), jnp.float32, -k, k)
    b_ih = jax.random.uniform(k4, (4 * hidden_size,), jnp.float32, -k, k)
    b_hh = jax.random.uniform(k5, (4 * hidden_size,), jnp.float32, -k, k)

    # nn.Linear(hidden_size, vocab_size): weight (V, H); keep transposed (H, V).
    w_cls = jax.random.uniform(k6, (hidden_size, vocab_size), jnp.float32, -k, k)
    b_cls = jax.random.uniform(k7, (vocab_size,), jnp.float32, -k, k)

    return dict(
        emb=emb,
        w_ih=w_ih,
        w_hh=w_hh,
        b=(b_ih + b_hh)[None, :],
        w_cls=w_cls,
        b_cls=b_cls[None, :],
    )


def reference_forward(x, params):
    """Pure-JAX, full-f32 reference (true LSTM semantics) via lax.scan.

    The kernel uses bf16 recurrent weights / bf16 input-gate stream with f32
    accumulation, so the comparison tolerance below is set for that.
    """
    H = params["w_hh"].shape[0]
    B = x.shape[0]
    emb = jnp.take(params["emb"], x, axis=0)                  # (B, T, E)
    emb_tm = jnp.transpose(emb, (1, 0, 2))                    # (T, B, E)

    def step(carry, x_t):
        h, c = carry
        gates = x_t @ params["w_ih"] + params["b"] + h @ params["w_hh"]
        i = jax.nn.sigmoid(gates[:, :H])
        f = jax.nn.sigmoid(gates[:, H:2 * H])
        g = jnp.tanh(gates[:, 2 * H:3 * H])
        o = jax.nn.sigmoid(gates[:, 3 * H:])
        c = f * c + i * g
        h = o * jnp.tanh(c)
        return (h, c), h

    init = (jnp.zeros((B, H), jnp.float32), jnp.zeros((B, H), jnp.float32))
    _, hs = jax.lax.scan(step, init, emb_tm)                  # (T, B, H)
    logits_tm = hs @ params["w_cls"] + params["b_cls"]
    return jnp.transpose(logits_tm, (1, 0, 2))                # (B, T, V)


if __name__ == "__main__":
    # Small shapes consistent with the module's forward: (B, T) token ids.
    VOCAB, EMB, HIDDEN = 64, 16, 32
    B, T = 2, 8

    key = jax.random.PRNGKey(0)
    pkey, xkey = jax.random.split(key)
    params = make_params(pkey, VOCAB, EMB, HIDDEN, pad_idx=0)
    x = jax.random.randint(xkey, (B, T), 0, VOCAB, dtype=jnp.int32)

    logits = jax.block_until_ready(textgen_rnn_forward(x, params))
    ref = jax.block_until_ready(reference_forward(x, params))

    assert logits.shape == (B, T, VOCAB)
    # bf16 recurrent weights / bf16 gate stream vs. full-f32 reference.
    assert jnp.allclose(logits, ref, atol=3e-2, rtol=3e-2), \
        float(jnp.max(jnp.abs(logits - ref)))
    print("KERNEL_OK")
</pallas_src>

<mosaic_0001>
module attributes {stable_mosaic.version = 11 : i64} {
  func.func @lstm_recurrence_kernel(%arg0: i32, %arg1: i32, %arg2: memref<8x8x512xbf16, #tpu.memory_space<vmem>>, %arg3: memref<128x512xbf16, #tpu.memory_space<vmem>>, %arg4: memref<8x8x128xf32, #tpu.memory_space<vmem>>, %arg5: memref<8x128xf32, #tpu.memory_space<vmem>>, %arg6: memref<8x128xf32, #tpu.memory_space<vmem>>) attributes {dimension_semantics = [#tpu.dimension_semantics<parallel>, #tpu.dimension_semantics<arbitrary>], iteration_bounds = array<i64: 1, 1>, scalar_prefetch = 0 : i64, scratch_operands = 2 : i64, tpu.core_type = #tpu.core_type<tc>, window_params = [{transform_indices = @transform_0, window_bounds = array<i64: 8, 8, 512>}, {pipeline_mode = #tpu.pipeline_mode<synchronous>, transform_indices = @transform_1, window_bounds = array<i64: 128, 512>}, {transform_indices = @transform_2, window_bounds = array<i64: 8, 8, 128>}]} {
    %c0_i32 = arith.constant 0 : i32
    %0 = arith.cmpi eq, %arg1, %c0_i32 : i32
    %1 = arith.extui %0 : i1 to i32
    %c0_i32_0 = arith.constant 0 : i32
    %2 = arith.cmpi ne, %1, %c0_i32_0 : i32
    scf.if %2 {
      %cst_122 = arith.constant 0.000000e+00 : f32
      %344 = vector.broadcast %cst_122 : f32 to vector<8x128xf32>
      %c0_123 = arith.constant 0 : index
      %c0_124 = arith.constant 0 : index
      %345 = vector.load %arg5[%c0_123, %c0_124] : memref<8x128xf32, #tpu.memory_space<vmem>>, vector<8x128xf32>
      tpu.vector_store %arg5[%c0_123, %c0_124], %344 {strides = array<i32>} : memref<8x128xf32, #tpu.memory_space<vmem>>, vector<8x128xf32>,
      %cst_125 = arith.constant 0.000000e+00 : f32
      %346 = vector.broadcast %cst_125 : f32 to vector<8x128xf32>
      %c0_126 = arith.constant 0 : index
      %c0_127 = arith.constant 0 : index
      %347 = vector.load %arg6[%c0_126, %c0_127] : memref<8x128xf32, #tpu.memory_space<vmem>>, vector<8x128xf32>
      tpu.vector_store %arg6[%c0_126, %c0_127], %346 {strides = array<i32>} : memref<8x128xf32, #tpu.memory_space<vmem>>, vector<8x128xf32>,
    } else {
    }
    %c0 = arith.constant 0 : index
    %c0_1 = arith.constant 0 : index
    %3 = vector.load %arg3[%c0, %c0_1] : memref<128x512xbf16, #tpu.memory_space<vmem>>, vector<128x512xbf16>
    %c0_2 = arith.constant 0 : index
    %c0_3 = arith.constant 0 : index
    %4 = vector.load %arg5[%c0_2, %c0_3] : memref<8x128xf32, #tpu.memory_space<vmem>>, vector<8x128xf32>
    %c0_4 = arith.constant 0 : index
    %c0_5 = arith.constant 0 : index
    %5 = vector.load %arg6[%c0_4, %c0_5] : memref<8x128xf32, #tpu.memory_space<vmem>>, vector<8x128xf32>
    %c0_i32_6 = arith.constant 0 : i32
    %6 = arith.truncf %4 : vector<8x128xf32> to vector<8x128xbf16>
    %cst = arith.constant dense<0.000000e+00> : vector<8x512xf32>
    %7 = tpu.matmul %6, %3, %cst {dimension_numbers = #tpu.dot_dimension_numbers<[1], [0], [0], [1], [0, 0, 1, 1], [], []>} : vector<8x128xbf16>, vector<128x512xbf16>, vector<8x512xf32> -> vector<8x512xf32>
    %8 = arith.index_cast %c0_i32_6 : i32 to index
    %c0_7 = arith.constant 0 : index
    %c0_8 = arith.constant 0 : index
    %9 = vector.load %arg2[%8, %c0_7, %c0_8] : memref<8x8x512xbf16, #tpu.memory_space<vmem>>, vector<1x8x512xbf16>
    %10 = vector.shape_cast %9 : vector<1x8x512xbf16> to vector<8x512xbf16>
    %11 = arith.extf %10 : vector<8x512xbf16> to vector<8x512xf32>
    %12 = arith.addf %7, %11 : vector<8x512xf32>
    %13 = vector.extract_strided_slice %12 {offsets = [0, 0], sizes = [8, 128], strides = [1, 1]} : vector<8x512xf32> to vector<8x128xf32>
    %cst_9 = arith.constant 5.000000e-01 : f32
    %14 = vector.broadcast %cst_9 : f32 to vector<8x128xf32>
    %15 = arith.mulf %14, %13 : vector<8x128xf32>
    %16 = math.tanh %15 : vector<8x128xf32>
    %cst_10 = arith.constant 5.000000e-01 : f32
    %17 = vector.broadcast %cst_10 : f32 to vector<8x128xf32>
    %18 = arith.mulf %17, %16 : vector<8x128xf32>
    %cst_11 = arith.constant 5.000000e-01 : f32
    %19 = vector.broadcast %cst_11 : f32 to vector<8x128xf32>
    %20 = arith.addf %18, %19 : vector<8x128xf32>
    %21 = vector.extract_strided_slice %12 {offsets = [0, 128], sizes = [8, 128], strides = [1, 1]} : vector<8x512xf32> to vector<8x128xf32>
    %cst_12 = arith.constant 5.000000e-01 : f32
    %22 = vector.broadcast %cst_12 : f32 to vector<8x128xf32>
    %23 = arith.mulf %22, %21 : vector<8x128xf32>
    %24 = math.tanh %23 : vector<8x128xf32>
    %cst_13 = arith.constant 5.000000e-01 : f32
    %25 = vector.broadcast %cst_13 : f32 to vector<8x128xf32>
    %26 = arith.mulf %25, %24 : vector<8x128xf32>
    %cst_14 = arith.constant 5.000000e-01 : f32
    %27 = vector.broadcast %cst_14 : f32 to vector<8x128xf32>
    %28 = arith.addf %26, %27 : vector<8x128xf32>
    %29 = vector.extract_strided_slice %12 {offsets = [0, 256], sizes = [8, 128], strides = [1, 1]} : vector<8x512xf32> to vector<8x128xf32>
    %30 = math.tanh %29 : vector<8x128xf32>
    %31 = vector.extract_strided_slice %12 {offsets = [0, 384], sizes = [8, 128], strides = [1, 1]} : vector<8x512xf32> to vector<8x128xf32>
    %cst_15 = arith.constant 5.000000e-01 : f32
    %32 = vector.broadcast %cst_15 : f32 to vector<8x128xf32>
    %33 = arith.mulf %32, %31 : vector<8x128xf32>
    %34 = math.tanh %33 : vector<8x128xf32>
    %cst_16 = arith.constant 5.000000e-01 : f32
    %35 = vector.broadcast %cst_16 : f32 to vector<8x128xf32>
    %36 = arith.mulf %35, %34 : vector<8x128xf32>
    %cst_17 = arith.constant 5.000000e-01 : f32
    %37 = vector.broadcast %cst_17 : f32 to vector<8x128xf32>
    %38 = arith.addf %36, %37 : vector<8x128xf32>
    %39 = arith.mulf %28, %5 : vector<8x128xf32>
    %40 = arith.mulf %20, %30 : vector<8x128xf32>
    %41 = arith.addf %39, %40 : vector<8x128xf32>
    %42 = math.tanh %41 : vector<8x128xf32>
    %43 = arith.mulf %38, %42 : vector<8x128xf32>
    %44 = arith.index_cast %c0_i32_6 : i32 to index
    %c0_18 = arith.constant 0 : index
    %c0_19 = arith.constant 0 : index
    %45 = vector.load %arg4[%44, %c0_18, %c0_19] : memref<8x8x128xf32, #tpu.memory_space<vmem>>, vector<1x8x128xf32>
    %46 = vector.shape_cast %45 : vector<1x8x128xf32> to vector<8x128xf32>
    %47 = vector.shape_cast %43 : vector<8x128xf32> to vector<1x8x128xf32>
    tpu.vector_store %arg4[%44, %c0_18, %c0_19], %47 {strides = array<i32>} : memref<8x8x128xf32, #tpu.memory_space<vmem>>, vector<1x8x128xf32>,
    %c1_i32 = arith.constant 1 : i32
    %48 = arith.truncf %43 : vector<8x128xf32> to vector<8x128xbf16>
    %cst_20 = arith.constant dense<0.000000e+00> : vector<8x512xf32>
    %49 = tpu.matmul %48, %3, %cst_20 {dimension_numbers = #tpu.dot_dimension_numbers<[1], [0], [0], [1], [0, 0, 1, 1], [], []>} : vector<8x128xbf16>, vector<128x512xbf16>, vector<8x512xf32> -> vector<8x512xf32>
    %50 = arith.index_cast %c1_i32 : i32 to index
    %c0_21 = arith.constant 0 : index
    %c0_22 = arith.constant 0 : index
    %51 = vector.load %arg2[%50, %c0_21, %c0_22] : memref<8x8x512xbf16, #tpu.memory_space<vmem>>, vector<1x8x512xbf16>
    %52 = vector.shape_cast %51 : vector<1x8x512xbf16> to vector<8x512xbf16>
    %53 = arith.extf %52 : vector<8x512xbf16> to vector<8x512xf32>
    %54 = arith.addf %49, %53 : vector<8x512xf32>
    %55 = vector.extract_strided_slice %54 {offsets = [0, 0], sizes = [8, 128], strides = [1, 1]} : vector<8x512xf32> to vector<8x128xf32>
    %cst_23 = arith.constant 5.000000e-01 : f32
    %56 = vector.broadcast %cst_23 : f32 to vector<8x128xf32>
    %57 = arith.mulf %56, %55 : vector<8x128xf32>
    %58 = math.tanh %57 : vector<8x128xf32>
    %cst_24 = arith.constant 5.000000e-01 : f32
    %59 = vector.broadcast %cst_24 : f32 to vector<8x128xf32>
    %60 = arith.mulf %59, %58 : vector<8x128xf32>
    %cst_25 = arith.constant 5.000000e-01 : f32
    %61 = vector.broadcast %cst_25 : f32 to vector<8x128xf32>
    %62 = arith.addf %60, %61 : vector<8x128xf32>
    %63 = vector.extract_strided_slice %54 {offsets = [0, 128], sizes = [8, 128], strides = [1, 1]} : vector<8x512xf32> to vector<8x128xf32>
    %cst_26 = arith.constant 5.000000e-01 : f32
    %64 = vector.broadcast %cst_26 : f32 to vector<8x128xf32>
    %65 = arith.mulf %64, %63 : vector<8x128xf32>
    %66 = math.tanh %65 : vector<8x128xf32>
    %cst_27 = arith.constant 5.000000e-01 : f32
    %67 = vector.broadcast %cst_27 : f32 to vector<8x128xf32>
    %68 = arith.mulf %67, %66 : vector<8x128xf32>
    %cst_28 = arith.constant 5.000000e-01 : f32
    %69 = vector.broadcast %cst_28 : f32 to vector<8x128xf32>
    %70 = arith.addf %68, %69 : vector<8x128xf32>
    %71 = vector.extract_strided_slice %54 {offsets = [0, 256], sizes = [8, 128], strides = [1, 1]} : vector<8x512xf32> to vector<8x128xf32>
    %72 = math.tanh %71 : vector<8x128xf32>
    %73 = vector.extract_strided_slice %54 {offsets = [0, 384], sizes = [8, 128], strides = [1, 1]} : vector<8x512xf32> to vector<8x128xf32>
    %cst_29 = arith.constant 5.000000e-01 : f32
    %74 = vector.broadcast %cst_29 : f32 to vector<8x128xf32>
    %75 = arith.mulf %74, %73 : vector<8x128xf32>
    %76 = math.tanh %75 : vector<8x128xf32>
    %cst_30 = arith.constant 5.000000e-01 : f32
    %77 = vector.broadcast %cst_30 : f32 to vector<8x128xf32>
    %78 = arith.mulf %77, %76 : vector<8x128xf32>
    %cst_31 = arith.constant 5.000000e-01 : f32
    %79 = vector.broadcast %cst_31 : f32 to vector<8x128xf32>
    %80 = arith.addf %78, %79 : vector<8x128xf32>
    %81 = arith.mulf %70, %41 : vector<8x128xf32>
    %82 = arith.mulf %62, %72 : vector<8x128xf32>
    %83 = arith.addf %81, %82 : vector<8x128xf32>
    %84 = math.tanh %83 : vector<8x128xf32>
    %85 = arith.mulf %80, %84 : vector<8x128xf32>
    %86 = arith.index_cast %c1_i32 : i32 to index
    %c0_32 = arith.constant 0 : index
    %c0_33 = arith.constant 0 : index
    %87 = vector.load %arg4[%86, %c0_32, %c0_33] : memref<8x8x128xf32, #tpu.memory_space<vmem>>, vector<1x8x128xf32>
    %88 = vector.shape_cast %87 : vector<1x8x128xf32> to vector<8x128xf32>
    %89 = vector.shape_cast %85 : vector<8x128xf32> to vector<1x8x128xf32>
    tpu.vector_store %arg4[%86, %c0_32, %c0_33], %89 {strides = array<i32>} : memref<8x8x128xf32, #tpu.memory_space<vmem>>, vector<1x8x128xf32>,
    %c2_i32 = arith.constant 2 : i32
    %90 = arith.truncf %85 : vector<8x128xf32> to vector<8x128xbf16>
    %cst_34 = arith.constant dense<0.000000e+00> : vector<8x512xf32>
    %91 = tpu.matmul %90, %3, %cst_34 {dimension_numbers = #tpu.dot_dimension_numbers<[1], [0], [0], [1], [0, 0, 1, 1], [], []>} : vector<8x128xbf16>, vector<128x512xbf16>, vector<8x512xf32> -> vector<8x512xf32>
    %92 = arith.index_cast %c2_i32 : i32 to index
    %c0_35 = arith.constant 0 : index
    %c0_36 = arith.constant 0 : index
    %93 = vector.load %arg2[%92, %c0_35, %c0_36] : memref<8x8x512xbf16, #tpu.memory_space<vmem>>, vector<1x8x512xbf16>
    %94 = vector.shape_cast %93 : vector<1x8x512xbf16> to vector<8x512xbf16>
    %95 = arith.extf %94 : vector<8x512xbf16> to vector<8x512xf32>
    %96 = arith.addf %91, %95 : vector<8x512xf32>
    %97 = vector.extract_strided_slice %96 {offsets = [0, 0], sizes = [8, 128], strides = [1, 1]} : vector<8x512xf32> to vector<8x128xf32>
    %cst_37 = arith.constant 5.000000e-01 : f32
    %98 = vector.broadcast %cst_37 : f32 to vector<8x128xf32>
    %99 = arith.mulf %98, %97 : vector<8x128xf32>
    %100 = math.tanh %99 : vector<8x128xf32>
    %cst_38 = arith.constant 5.000000e-01 : f32
    %101 = vector.broadcast %cst_38 : f32 to vector<8x128xf32>
    %102 = arith.mulf %101, %100 : vector<8x128xf32>
    %cst_39 = arith.constant 5.000000e-01 : f32
    %103 = vector.broadcast %cst_39 : f32 to vector<8x128xf32>
    %104 = arith.addf %102, %103 : vector<8x128xf32>
    %105 = vector.extract_strided_slice %96 {offsets = [0, 128], sizes = [8, 128], strides = [1, 1]} : vector<8x512xf32> to vector<8x128xf32>
    %cst_40 = arith.constant 5.000000e-01 : f32
    %106 = vector.broadcast %cst_40 : f32 to vector<8x128xf32>
    %107 = arith.mulf %106, %105 : vector<8x128xf32>
    %108 = math.tanh %107 : vector<8x128xf32>
    %cst_41 = arith.constant 5.000000e-01 : f32
    %109 = vector.broadcast %cst_41 : f32 to vector<8x128xf32>
    %110 = arith.mulf %109, %108 : vector<8x128xf32>
    %cst_42 = arith.constant 5.000000e-01 : f32
    %111 = vector.broadcast %cst_42 : f32 to vector<8x128xf32>
    %112 = arith.addf %110, %111 : vector<8x128xf32>
    %113 = vector.extract_strided_slice %96 {offsets = [0, 256], sizes = [8, 128], strides = [1, 1]} : vector<8x512xf32> to vector<8x128xf32>
    %114 = math.tanh %113 : vector<8x128xf32>
    %115 = vector.extract_strided_slice %96 {offsets = [0, 384], sizes = [8, 128], strides = [1, 1]} : vector<8x512xf32> to vector<8x128xf32>
    %cst_43 = arith.constant 5.000000e-01 : f32
    %116 = vector.broadcast %cst_43 : f32 to vector<8x128xf32>
    %117 = arith.mulf %116, %115 : vector<8x128xf32>
    %118 = math.tanh %117 : vector<8x128xf32>
    %cst_44 = arith.constant 5.000000e-01 : f32
    %119 = vector.broadcast %cst_44 : f32 to vector<8x128xf32>
    %120 = arith.mulf %119, %118 : vector<8x128xf32>
    %cst_45 = arith.constant 5.000000e-01 : f32
    %121 = vector.broadcast %cst_45 : f32 to vector<8x128xf32>
    %122 = arith.addf %120, %121 : vector<8x128xf32>
    %123 = arith.mulf %112, %83 : vector<8x128xf32>
    %124 = arith.mulf %104, %114 : vector<8x128xf32>
    %125 = arith.addf %123, %124 : vector<8x128xf32>
    %126 = math.tanh %125 : vector<8x128xf32>
    %127 = arith.mulf %122, %126 : vector<8x128xf32>
    %128 = arith.index_cast %c2_i32 : i32 to index
    %c0_46 = arith.constant 0 : index
    %c0_47 = arith.constant 0 : index
    %129 = vector.load %arg4[%128, %c0_46, %c0_47] : memref<8x8x128xf32, #tpu.memory_space<vmem>>, vector<1x8x128xf32>
    %130 = vector.shape_cast %129 : vector<1x8x128xf32> to vector<8x128xf32>
    %131 = vector.shape_cast %127 : vector<8x128xf32> to vector<1x8x128xf32>
    tpu.vector_store %arg4[%128, %c0_46, %c0_47], %131 {strides = array<i32>} : memref<8x8x128xf32, #tpu.memory_space<vmem>>, vector<1x8x128xf32>,
    %c3_i32 = arith.constant 3 : i32
    %132 = arith.truncf %127 : vector<8x128xf32> to vector<8x128xbf16>
    %cst_48 = arith.constant dense<0.000000e+00> : vector<8x512xf32>
    %133 = tpu.matmul %132, %3, %cst_48 {dimension_numbers = #tpu.dot_dimension_numbers<[1], [0], [0], [1], [0, 0, 1, 1], [], []>} : vector<8x128xbf16>, vector<128x512xbf16>, vector<8x512xf32> -> vector<8x512xf32>
    %134 = arith.index_cast %c3_i32 : i32 to index
    %c0_49 = arith.constant 0 : index
    %c0_50 = arith.constant 0 : index
    %135 = vector.load %arg2[%134, %c0_49, %c0_50] : memref<8x8x512xbf16, #tpu.memory_space<vmem>>, vector<1x8x512xbf16>
    %136 = vector.shape_cast %135 : vector<1x8x512xbf16> to vector<8x512xbf16>
    %137 = arith.extf %136 : vector<8x512xbf16> to vector<8x512xf32>
    %138 = arith.addf %133, %137 : vector<8x512xf32>
    %139 = vector.extract_strided_slice %138 {offsets = [0, 0], sizes = [8, 128], strides = [1, 1]} : vector<8x512xf32> to vector<8x128xf32>
    %cst_51 = arith.constant 5.000000e-01 : f32
    %140 = vector.broadcast %cst_51 : f32 to vector<8x128xf32>
    %141 = arith.mulf %140, %139 : vector<8x128xf32>
    %142 = math.tanh %141 : vector<8x128xf32>
    %cst_52 = arith.constant 5.000000e-01 : f32
    %143 = vector.broadcast %cst_52 : f32 to vector<8x128xf32>
    %144 = arith.mulf %143, %142 : vector<8x128xf32>
    %cst_53 = arith.constant 5.000000e-01 : f32
    %145 = vector.broadcast %cst_53 : f32 to vector<8x128xf32>
    %146 = arith.addf %144, %145 : vector<8x128xf32>
    %147 = vector.extract_strided_slice %138 {offsets = [0, 128], sizes = [8, 128], strides = [1, 1]} : vector<8x512xf32> to vector<8x128xf32>
    %cst_54 = arith.constant 5.000000e-01 : f32
    %148 = vector.broadcast %cst_54 : f32 to vector<8x128xf32>
    %149 = arith.mulf %148, %147 : vector<8x128xf32>
    %150 = math.tanh %149 : vector<8x128xf32>
    %cst_55 = arith.constant 5.000000e-01 : f32
    %151 = vector.broadcast %cst_55 : f32 to vector<8x128xf32>
    %152 = arith.mulf %151, %150 : vector<8x128xf32>
    %cst_56 = arith.constant 5.000000e-01 : f32
    %153 = vector.broadcast %cst_56 : f32 to vector<8x128xf32>
    %154 = arith.addf %152, %153 : vector<8x128xf32>
    %155 = vector.extract_strided_slice %138 {offsets = [0, 256], sizes = [8, 128], strides = [1, 1]} : vector<8x512xf32> to vector<8x128xf32>
    %156 = math.tanh %155 : vector<8x128xf32>
    %157 = vector.extract_strided_slice %138 {offsets = [0, 384], sizes = [8, 128], strides = [1, 1]} : vector<8x512xf32> to vector<8x128xf32>
    %cst_57 = arith.constant 5.000000e-01 : f32
    %158 = vector.broadcast %cst_57 : f32 to vector<8x128xf32>
    %159 = arith.mulf %158, %157 : vector<8x128xf32>
    %160 = math.tanh %159 : vector<8x128xf32>
    %cst_58 = arith.constant 5.000000e-01 : f32
    %161 = vector.broadcast %cst_58 : f32 to vector<8x128xf32>
    %162 = arith.mulf %161, %160 : vector<8x128xf32>
    %cst_59 = arith.constant 5.000000e-01 : f32
    %163 = vector.broadcast %cst_59 : f32 to vector<8x128xf32>
    %164 = arith.addf %162, %163 : vector<8x128xf32>
    %165 = arith.mulf %154, %125 : vector<8x128xf32>
    %166 = arith.mulf %146, %156 : vector<8x128xf32>
    %167 = arith.addf %165, %166 : vector<8x128xf32>
    %168 = math.tanh %167 : vector<8x128xf32>
    %169 = arith.mulf %164, %168 : vector<8x128xf32>
    %170 = arith.index_cast %c3_i32 : i32 to index
    %c0_60 = arith.constant 0 : index
    %c0_61 = arith.constant 0 : index
    %171 = vector.load %arg4[%170, %c0_60, %c0_61] : memref<8x8x128xf32, #tpu.memory_space<vmem>>, vector<1x8x128xf32>
    %172 = vector.shape_cast %171 : vector<1x8x128xf32> to vector<8x128xf32>
    %173 = vector.shape_cast %169 : vector<8x128xf32> to vector<1x8x128xf32>
    tpu.vector_store %arg4[%170, %c0_60, %c0_61], %173 {strides = array<i32>} : memref<8x8x128xf32, #tpu.memory_space<vmem>>, vector<1x8x128xf32>,
    %c4_i32 = arith.constant 4 : i32
    %174 = arith.truncf %169 : vector<8x128xf32> to vector<8x128xbf16>
    %cst_62 = arith.constant dense<0.000000e+00> : vector<8x512xf32>
    %175 = tpu.matmul %174, %3, %cst_62 {dimension_numbers = #tpu.dot_dimension_numbers<[1], [0], [0], [1], [0, 0, 1, 1], [], []>} : vector<8x128xbf16>, vector<128x512xbf16>, vector<8x512xf32> -> vector<8x512xf32>
    %176 = arith.index_cast %c4_i32 : i32 to index
    %c0_63 = arith.constant 0 : index
    %c0_64 = arith.constant 0 : index
    %177 = vector.load %arg2[%176, %c0_63, %c0_64] : memref<8x8x512xbf16, #tpu.memory_space<vmem>>, vector<1x8x512xbf16>
    %178 = vector.shape_cast %177 : vector<1x8x512xbf16> to vector<8x512xbf16>
    %179 = arith.extf %178 : vector<8x512xbf16> to vector<8x512xf32>
    %180 = arith.addf %175, %179 : vector<8x512xf32>
    %181 = vector.extract_strided_slice %180 {offsets = [0, 0], sizes = [8, 128], strides = [1, 1]} : vector<8x512xf32> to vector<8x128xf32>
    %cst_65 = arith.constant 5.000000e-01 : f32
    %182 = vector.broadcast %cst_65 : f32 to vector<8x128xf32>
    %183 = arith.mulf %182, %181 : vector<8x128xf32>
    %184 = math.tanh %183 : vector<8x128xf32>
    %cst_66 = arith.constant 5.000000e-01 : f32
    %185 = vector.broadcast %cst_66 : f32 to vector<8x128xf32>
    %186 = arith.mulf %185, %184 : vector<8x128xf32>
    %cst_67 = arith.constant 5.000000e-01 : f32
    %187 = vector.broadcast %cst_67 : f32 to vector<8x128xf32>
    %188 = arith.addf %186, %187 : vector<8x128xf32>
    %189 = vector.extract_strided_slice %180 {offsets = [0, 128], sizes = [8, 128], strides = [1, 1]} : vector<8x512xf32> to vector<8x128xf32>
    %cst_68 = arith.constant 5.000000e-01 : f32
    %190 = vector.broadcast %cst_68 : f32 to vector<8x128xf32>
    %191 = arith.mulf %190, %189 : vector<8x128xf32>
    %192 = math.tanh %191 : vector<8x128xf32>
    %cst_69 = arith.constant 5.000000e-01 : f32
    %193 = vector.broadcast %cst_69 : f32 to vector<8x128xf32>
    %194 = arith.mulf %193, %192 : vector<8x128xf32>
    %cst_70 = arith.constant 5.000000e-01 : f32
    %195 = vector.broadcast %cst_70 : f32 to vector<8x128xf32>
    %196 = arith.addf %194, %195 : vector<8x128xf32>
    %197 = vector.extract_strided_slice %180 {offsets = [0, 256], sizes = [8, 128], strides = [1, 1]} : vector<8x512xf32> to vector<8x128xf32>
    %198 = math.tanh %197 : vector<8x128xf32>
    %199 = vector.extract_strided_slice %180 {offsets = [0, 384], sizes = [8, 128], strides = [1, 1]} : vector<8x512xf32> to vector<8x128xf32>
    %cst_71 = arith.constant 5.000000e-01 : f32
    %200 = vector.broadcast %cst_71 : f32 to vector<8x128xf32>
    %201 = arith.mulf %200, %199 : vector<8x128xf32>
    %202 = math.tanh %201 : vector<8x128xf32>
    %cst_72 = arith.constant 5.000000e-01 : f32
    %203 = vector.broadcast %cst_72 : f32 to vector<8x128xf32>
    %204 = arith.mulf %203, %202 : vector<8x128xf32>
    %cst_73 = arith.constant 5.000000e-01 : f32
    %205 = vector.broadcast %cst_73 : f32 to vector<8x128xf32>
    %206 = arith.addf %204, %205 : vector<8x128xf32>
    %207 = arith.mulf %196, %167 : vector<8x128xf32>
    %208 = arith.mulf %188, %198 : vector<8x128xf32>
    %209 = arith.addf %207, %208 : vector<8x128xf32>
    %210 = math.tanh %209 : vector<8x128xf32>
    %211 = arith.mulf %206, %210 : vector<8x128xf32>
    %212 = arith.index_cast %c4_i32 : i32 to index
    %c0_74 = arith.constant 0 : index
    %c0_75 = arith.constant 0 : index
    %213 = vector.load %arg4[%212, %c0_74, %c0_75] : memref<8x8x128xf32, #tpu.memory_space<vmem>>, vector<1x8x128xf32>
    %214 = vector.shape_cast %213 : vector<1x8x128xf32> to vector<8x128xf32>
    %215 = vector.shape_cast %211 : vector<8x128xf32> to vector<1x8x128xf32>
    tpu.vector_store %arg4[%212, %c0_74, %c0_75], %215 {strides = array<i32>} : memref<8x8x128xf32, #tpu.memory_space<vmem>>, vector<1x8x128xf32>,
    %c5_i32 = arith.constant 5 : i32
    %216 = arith.truncf %211 : vector<8x128xf32> to vector<8x128xbf16>
    %cst_76 = arith.constant dense<0.000000e+00> : vector<8x512xf32>
    %217 = tpu.matmul %216, %3, %cst_76 {dimension_numbers = #tpu.dot_dimension_numbers<[1], [0], [0], [1], [0, 0, 1, 1], [], []>} : vector<8x128xbf16>, vector<128x512xbf16>, vector<8x512xf32> -> vector<8x512xf32>
    %218 = arith.index_cast %c5_i32 : i32 to index
    %c0_77 = arith.constant 0 : index
    %c0_78 = arith.constant 0 : index
    %219 = vector.load %arg2[%218, %c0_77, %c0_78] : memref<8x8x512xbf16, #tpu.memory_space<vmem>>, vector<1x8x512xbf16>
    %220 = vector.shape_cast %219 : vector<1x8x512xbf16> to vector<8x512xbf16>
    %221 = arith.extf %220 : vector<8x512xbf16> to vector<8x512xf32>
    %222 = arith.addf %217, %221 : vector<8x512xf32>
    %223 = vector.extract_strided_slice %222 {offsets = [0, 0], sizes = [8, 128], strides = [1, 1]} : vector<8x512xf32> to vector<8x128xf32>
    %cst_79 = arith.constant 5.000000e-01 : f32
    %224 = vector.broadcast %cst_79 : f32 to vector<8x128xf32>
    %225 = arith.mulf %224, %223 : vector<8x128xf32>
    %226 = math.tanh %225 : vector<8x128xf32>
    %cst_80 = arith.constant 5.000000e-01 : f32
    %227 = vector.broadcast %cst_80 : f32 to vector<8x128xf32>
    %228 = arith.mulf %227, %226 : vector<8x128xf32>
    %cst_81 = arith.constant 5.000000e-01 : f32
    %229 = vector.broadcast %cst_81 : f32 to vector<8x128xf32>
    %230 = arith.addf %228, %229 : vector<8x128xf32>
    %231 = vector.extract_strided_slice %222 {offsets = [0, 128], sizes = [8, 128], strides = [1, 1]} : vector<8x512xf32> to vector<8x128xf32>
    %cst_82 = arith.constant 5.000000e-01 : f32
    %232 = vector.broadcast %cst_82 : f32 to vector<8x128xf32>
    %233 = arith.mulf %232, %231 : vector<8x128xf32>
    %234 = math.tanh %233 : vector<8x128xf32>
    %cst_83 = arith.constant 5.000000e-01 : f32
    %235 = vector.broadcast %cst_83 : f32 to vector<8x128xf32>
    %236 = arith.mulf %235, %234 : vector<8x128xf32>
    %cst_84 = arith.constant 5.000000e-01 : f32
    %237 = vector.broadcast %cst_84 : f32 to vector<8x128xf32>
    %238 = arith.addf %236, %237 : vector<8x128xf32>
    %239 = vector.extract_strided_slice %222 {offsets = [0, 256], sizes = [8, 128], strides = [1, 1]} : vector<8x512xf32> to vector<8x128xf32>
    %240 = math.tanh %239 : vector<8x128xf32>
    %241 = vector.extract_strided_slice %222 {offsets = [0, 384], sizes = [8, 128], strides = [1, 1]} : vector<8x512xf32> to vector<8x128xf32>
    %cst_85 = arith.constant 5.000000e-01 : f32
    %242 = vector.broadcast %cst_85 : f32 to vector<8x128xf32>
    %243 = arith.mulf %242, %241 : vector<8x128xf32>
    %244 = math.tanh %243 : vector<8x128xf32>
    %cst_86 = arith.constant 5.000000e-01 : f32
    %245 = vector.broadcast %cst_86 : f32 to vector<8x128xf32>
    %246 = arith.mulf %245, %244 : vector<8x128xf32>
    %cst_87 = arith.constant 5.000000e-01 : f32
    %247 = vector.broadcast %cst_87 : f32 to vector<8x128xf32>
    %248 = arith.addf %246, %247 : vector<8x128xf32>
    %249 = arith.mulf %238, %209 : vector<8x128xf32>
    %250 = arith.mulf %230, %240 : vector<8x128xf32>
    %251 = arith.addf %249, %250 : vector<8x128xf32>
    %252 = math.tanh %251 : vector<8x128xf32>
    %253 = arith.mulf %248, %252 : vector<8x128xf32>
    %254 = arith.index_cast %c5_i32 : i32 to index
    %c0_88 = arith.constant 0 : index
    %c0_89 = arith.constant 0 : index
    %255 = vector.load %arg4[%254, %c0_88, %c0_89] : memref<8x8x128xf32, #tpu.memory_space<vmem>>, vector<1x8x128xf32>
    %256 = vector.shape_cast %255 : vector<1x8x128xf32> to vector<8x128xf32>
    %257 = vector.shape_cast %253 : vector<8x128xf32> to vector<1x8x128xf32>
    tpu.vector_store %arg4[%254, %c0_88, %c0_89], %257 {strides = array<i32>} : memref<8x8x128xf32, #tpu.memory_space<vmem>>, vector<1x8x128xf32>,
    %c6_i32 = arith.constant 6 : i32
    %258 = arith.truncf %253 : vector<8x128xf32> to vector<8x128xbf16>
    %cst_90 = arith.constant dense<0.000000e+00> : vector<8x512xf32>
    %259 = tpu.matmul %258, %3, %cst_90 {dimension_numbers = #tpu.dot_dimension_numbers<[1], [0], [0], [1], [0, 0, 1, 1], [], []>} : vector<8x128xbf16>, vector<128x512xbf16>, vector<8x512xf32> -> vector<8x512xf32>
    %260 = arith.index_cast %c6_i32 : i32 to index
    %c0_91 = arith.constant 0 : index
    %c0_92 = arith.constant 0 : index
    %261 = vector.load %arg2[%260, %c0_91, %c0_92] : memref<8x8x512xbf16, #tpu.memory_space<vmem>>, vector<1x8x512xbf16>
    %262 = vector.shape_cast %261 : vector<1x8x512xbf16> to vector<8x512xbf16>
    %263 = arith.extf %262 : vector<8x512xbf16> to vector<8x512xf32>
    %264 = arith.addf %259, %263 : vector<8x512xf32>
    %265 = vector.extract_strided_slice %264 {offsets = [0, 0], sizes = [8, 128], strides = [1, 1]} : vector<8x512xf32> to vector<8x128xf32>
    %cst_93 = arith.constant 5.000000e-01 : f32
    %266 = vector.broadcast %cst_93 : f32 to vector<8x128xf32>
    %267 = arith.mulf %266, %265 : vector<8x128xf32>
    %268 = math.tanh %267 : vector<8x128xf32>
    %cst_94 = arith.constant 5.000000e-01 : f32
    %269 = vector.broadcast %cst_94 : f32 to vector<8x128xf32>
    %270 = arith.mulf %269, %268 : vector<8x128xf32>
    %cst_95 = arith.constant 5.000000e-01 : f32
    %271 = vector.broadcast %cst_95 : f32 to vector<8x128xf32>
    %272 = arith.addf %270, %271 : vector<8x128xf32>
    %273 = vector.extract_strided_slice %264 {offsets = [0, 128], sizes = [8, 128], strides = [1, 1]} : vector<8x512xf32> to vector<8x128xf32>
    %cst_96 = arith.constant 5.000000e-01 : f32
    %274 = vector.broadcast %cst_96 : f32 to vector<8x128xf32>
    %275 = arith.mulf %274, %273 : vector<8x128xf32>
    %276 = math.tanh %275 : vector<8x128xf32>
    %cst_97 = arith.constant 5.000000e-01 : f32
    %277 = vector.broadcast %cst_97 : f32 to vector<8x128xf32>
    %278 = arith.mulf %277, %276 : vector<8x128xf32>
    %cst_98 = arith.constant 5.000000e-01 : f32
    %279 = vector.broadcast %cst_98 : f32 to vector<8x128xf32>
    %280 = arith.addf %278, %279 : vector<8x128xf32>
    %281 = vector.extract_strided_slice %264 {offsets = [0, 256], sizes = [8, 128], strides = [1, 1]} : vector<8x512xf32> to vector<8x128xf32>
    %282 = math.tanh %281 : vector<8x128xf32>
    %283 = vector.extract_strided_slice %264 {offsets = [0, 384], sizes = [8, 128], strides = [1, 1]} : vector<8x512xf32> to vector<8x128xf32>
    %cst_99 = arith.constant 5.000000e-01 : f32
    %284 = vector.broadcast %cst_99 : f32 to vector<8x128xf32>
    %285 = arith.mulf %284, %283 : vector<8x128xf32>
    %286 = math.tanh %285 : vector<8x128xf32>
    %cst_100 = arith.constant 5.000000e-01 : f32
    %287 = vector.broadcast %cst_100 : f32 to vector<8x128xf32>
    %288 = arith.mulf %287, %286 : vector<8x128xf32>
    %cst_101 = arith.constant 5.000000e-01 : f32
    %289 = vector.broadcast %cst_101 : f32 to vector<8x128xf32>
    %290 = arith.addf %288, %289 : vector<8x128xf32>
    %291 = arith.mulf %280, %251 : vector<8x128xf32>
    %292 = arith.mulf %272, %282 : vector<8x128xf32>
    %293 = arith.addf %291, %292 : vector<8x128xf32>
    %294 = math.tanh %293 : vector<8x128xf32>
    %295 = arith.mulf %290, %294 : vector<8x128xf32>
    %296 = arith.index_cast %c6_i32 : i32 to index
    %c0_102 = arith.constant 0 : index
    %c0_103 = arith.constant 0 : index
    %297 = vector.load %arg4[%296, %c0_102, %c0_103] : memref<8x8x128xf32, #tpu.memory_space<vmem>>, vector<1x8x128xf32>
    %298 = vector.shape_cast %297 : vector<1x8x128xf32> to vector<8x128xf32>
    %299 = vector.shape_cast %295 : vector<8x128xf32> to vector<1x8x128xf32>
    tpu.vector_store %arg4[%296, %c0_102, %c0_103], %299 {strides = array<i32>} : memref<8x8x128xf32, #tpu.memory_space<vmem>>, vector<1x8x128xf32>,
    %c7_i32 = arith.constant 7 : i32
    %300 = arith.truncf %295 : vector<8x128xf32> to vector<8x128xbf16>
    %cst_104 = arith.constant dense<0.000000e+00> : vector<8x512xf32>
    %301 = tpu.matmul %300, %3, %cst_104 {dimension_numbers = #tpu.dot_dimension_numbers<[1], [0], [0], [1], [0, 0, 1, 1], [], []>} : vector<8x128xbf16>, vector<128x512xbf16>, vector<8x512xf32> -> vector<8x512xf32>
    %302 = arith.index_cast %c7_i32 : i32 to index
    %c0_105 = arith.constant 0 : index
    %c0_106 = arith.constant 0 : index
    %303 = vector.load %arg2[%302, %c0_105, %c0_106] : memref<8x8x512xbf16, #tpu.memory_space<vmem>>, vector<1x8x512xbf16>
    %304 = vector.shape_cast %303 : vector<1x8x512xbf16> to vector<8x512xbf16>
    %305 = arith.extf %304 : vector<8x512xbf16> to vector<8x512xf32>
    %306 = arith.addf %301, %305 : vector<8x512xf32>
    %307 = vector.extract_strided_slice %306 {offsets = [0, 0], sizes = [8, 128], strides = [1, 1]} : vector<8x512xf32> to vector<8x128xf32>
    %cst_107 = arith.constant 5.000000e-01 : f32
    %308 = vector.broadcast %cst_107 : f32 to vector<8x128xf32>
    %309 = arith.mulf %308, %307 : vector<8x128xf32>
    %310 = math.tanh %309 : vector<8x128xf32>
    %cst_108 = arith.constant 5.000000e-01 : f32
    %311 = vector.broadcast %cst_108 : f32 to vector<8x128xf32>
    %312 = arith.mulf %311, %310 : vector<8x128xf32>
    %cst_109 = arith.constant 5.000000e-01 : f32
    %313 = vector.broadcast %cst_109 : f32 to vector<8x128xf32>
    %314 = arith.addf %312, %313 : vector<8x128xf32>
    %315 = vector.extract_strided_slice %306 {offsets = [0, 128], sizes = [8, 128], strides = [1, 1]} : vector<8x512xf32> to vector<8x128xf32>
    %cst_110 = arith.constant 5.000000e-01 : f32
    %316 = vector.broadcast %cst_110 : f32 to vector<8x128xf32>
    %317 = arith.mulf %316, %315 : vector<8x128xf32>
    %318 = math.tanh %317 : vector<8x128xf32>
    %cst_111 = arith.constant 5.000000e-01 : f32
    %319 = vector.broadcast %cst_111 : f32 to vector<8x128xf32>
    %320 = arith.mulf %319, %318 : vector<8x128xf32>
    %cst_112 = arith.constant 5.000000e-01 : f32
    %321 = vector.broadcast %cst_112 : f32 to vector<8x128xf32>
    %322 = arith.addf %320, %321 : vector<8x128xf32>
    %323 = vector.extract_strided_slice %306 {offsets = [0, 256], sizes = [8, 128], strides = [1, 1]} : vector<8x512xf32> to vector<8x128xf32>
    %324 = math.tanh %323 : vector<8x128xf32>
    %325 = vector.extract_strided_slice %306 {offsets = [0, 384], sizes = [8, 128], strides = [1, 1]} : vector<8x512xf32> to vector<8x128xf32>
    %cst_113 = arith.constant 5.000000e-01 : f32
    %326 = vector.broadcast %cst_113 : f32 to vector<8x128xf32>
    %327 = arith.mulf %326, %325 : vector<8x128xf32>
    %328 = math.tanh %327 : vector<8x128xf32>
    %cst_114 = arith.constant 5.000000e-01 : f32
    %329 = vector.broadcast %cst_114 : f32 to vector<8x128xf32>
    %330 = arith.mulf %329, %328 : vector<8x128xf32>
    %cst_115 = arith.constant 5.000000e-01 : f32
    %331 = vector.broadcast %cst_115 : f32 to vector<8x128xf32>
    %332 = arith.addf %330, %331 : vector<8x128xf32>
    %333 = arith.mulf %322, %293 : vector<8x128xf32>
    %334 = arith.mulf %314, %324 : vector<8x128xf32>
    %335 = arith.addf %333, %334 : vector<8x128xf32>
    %336 = math.tanh %335 : vector<8x128xf32>
    %337 = arith.mulf %332, %336 : vector<8x128xf32>
    %338 = arith.index_cast %c7_i32 : i32 to index
    %c0_116 = arith.constant 0 : index
    %c0_117 = arith.constant 0 : index
    %339 = vector.load %arg4[%338, %c0_116, %c0_117] : memref<8x8x128xf32, #tpu.memory_space<vmem>>, vector<1x8x128xf32>
    %340 = vector.shape_cast %339 : vector<1x8x128xf32> to vector<8x128xf32>
    %341 = vector.shape_cast %337 : vector<8x128xf32> to vector<1x8x128xf32>
    tpu.vector_store %arg4[%338, %c0_116, %c0_117], %341 {strides = array<i32>} : memref<8x8x128xf32, #tpu.memory_space<vmem>>, vector<1x8x128xf32>,
    %c8_i32 = arith.constant 8 : i32
    %c0_118 = arith.constant 0 : index
    %c0_119 = arith.constant 0 : index
    %342 = vector.load %arg5[%c0_118, %c0_119] : memref<8x128xf32, #tpu.memory_space<vmem>>, vector<8x128xf32>
    tpu.vector_store %arg5[%c0_118, %c0_119], %337 {strides = array<i32>} : memref<8x128xf32, #tpu.memory_space<vmem>>, vector<8x128xf32>,
    %c0_120 = arith.constant 0 : index
    %c0_121 = arith.constant 0 : index
    %343 = vector.load %arg6[%c0_120, %c0_121] : memref<8x128xf32, #tpu.memory_space<vmem>>, vector<8x128xf32>
    tpu.vector_store %arg6[%c0_120, %c0_121], %335 {strides = array<i32>} : memref<8x128xf32, #tpu.memory_space<vmem>>, vector<8x128xf32>,
    return
  }
  func.func @transform_0(%arg0: i32, %arg1: i32) -> (i32, i32, i32) {
    %c0_i32 = arith.constant 0 : i32
    %c0_i32_0 = arith.constant 0 : i32
    return %arg1, %arg0, %c0_i32 : i32, i32, i32
  }
  func.func @transform_1(%arg0: i32, %arg1: i32) -> (i32, i32) {
    %c0_i32 = arith.constant 0 : i32
    %c0_i32_0 = arith.constant 0 : i32
    %c0_i32_1 = arith.constant 0 : i32
    return %c0_i32, %c0_i32_0 : i32, i32
  }
  func.func @transform_2(%arg0: i32, %arg1: i32) -> (i32, i32, i32) {
    %c0_i32 = arith.constant 0 : i32
    %c0_i32_0 = arith.constant 0 : i32
    return %arg1, %arg0, %c0_i32 : i32, i32, i32
  }
}

</mosaic_0001>

<bundles_post_ra>
// kernel: tpu_custom_call.1
= control target key start
LH: loop header
LB: loop body
LE: loop exit
PB: predicated region body
PF: predicated region fallthrough
CT: control target
= control target key end

     0   :  { %7 = vsyncpa [#allocation5], 0  ;;  %s1800_s0 = inlined_call_operand.hbm [shape: bf16[8,8,512], index: 0, kind: input, shape index: {}]   ;;  %s1801_s1 = inlined_call_operand.hbm [shape: bf16[128,512], index: 1, kind: input, shape index: {}]   ;;  %s1802_s2 = inlined_call_operand.hbm [shape: f32[8,8,128], index: 2, kind: output, shape index: {}]  }
   0x1   :  { %8 = vsyncpa [#allocation8], 0 }
   0x2   :  { %9 = vsyncpa [#allocation6], 0  ;;  %s1412_s9 = smov [#allocation4]   ;;  %s1340_s13 = scalar_lea.hbm %s1800_s0, 2048 }
   0x3   :  { %s15_s10 = sshll.u32 %s1412_s9, 4  ;;  %p1341_p0 = scmp.ne.s32.totalorder %s1800_s0, %s1340_s13  ;;  %s16_s10 = int_to_ptr.vmem [resolvable:$true] %s15_s10 }
   0x4   :  { %p1344_p1 = scmp.lt.u32.totalorder %s1340_s13, %s1800_s0 }
   0x6   :  { %p1346_p2 = pnand %p1344_p1, %p1341_p0 }
   0x8   :  { %1349 = shalt.err (!%p1346_p2)
}
   0x9   :  { %s1350_s18 = scalar_lea.vmem %s16_s10, 2048  ;;  %p1355_p4 = scmp.lt.s32.totalorder %s16_s10, %s16_s10 }
   0xa   :  { %p1351_p3 = scmp.ne.s32.totalorder %s16_s10, %s1350_s18  ;;  %p1356_p5 = scmp.lt.s32.totalorder %s1350_s18, %s1350_s18 }
   0xc   :  { %p1357_p6 = por %p1356_p5, %p1355_p4 }
   0xe   :  { %p1358_p7 = pnand %p1357_p6, %p1351_p3 }
  0x10   :  { %1361 = shalt.err (!%p1358_p7)
}
  0x11   :  { %s1413_s19 = smov 256   ;;  %s1414_s20 = smov 16  }
  0x12   :  { %21 = dma.hbm_to_vmem [thread:$0]  %s1800_s0, 2048, %s16_s10, [#allocation5], %s1413_s19, %s1413_s19, %s1414_s20  }
  0x13   :  { %s1415_s23 = smov [#allocation7]   ;;  %s1362_s27 = scalar_lea.hbm %s1801_s1, 4096 }
  0x14   :  { %s27_s24 = sshll.u32 %s1415_s23, 4  ;;  %p1363_p8 = scmp.ne.s32.totalorder %s1801_s1, %s1362_s27  ;;  %s28_s24 = int_to_ptr.vmem [resolvable:$true] %s27_s24 }
  0x15   :  { %p1366_p9 = scmp.lt.u32.totalorder %s1362_s27, %s1801_s1 }
  0x17   :  { %p1368_p10 = pnand %p1366_p9, %p1363_p8 }
  0x19   :  { %1371 = shalt.err (!%p1368_p10)
}
  0x1a   :  { %s1372_s4 = scalar_lea.vmem %s28_s24, 4096  ;;  %p1377_p12 = scmp.lt.s32.totalorder %s28_s24, %s28_s24 }
  0x1b   :  { %p1373_p11 = scmp.ne.s32.totalorder %s28_s24, %s1372_s4  ;;  %p1378_p13 = scmp.lt.s32.totalorder %s1372_s4, %s1372_s4 }
  0x1d   :  { %p1379_p0 = por %p1378_p13, %p1377_p12 }
  0x1f   :  { %p1380_p1 = pnand %p1379_p0, %p1373_p11 }
  0x21   :  { %1383 = shalt.err (!%p1380_p1)
}
  0x22   :  { %33 = dma.hbm_to_vmem [thread:$0]  %s1801_s1, 4096, %s28_s24, [#allocation8], %s1413_s19, %s1413_s19, %s1414_s20  }
  0x23   :  { %1406 = dma.done.wait [#allocation5], 2048  }
  0x24   :  { %1407 = vsyncadd [#allocation5], 4294965248 }
  0x25   :  { %1408 = dma.done.wait [#allocation8], 4096  }
  0x26   :  { %1409 = vsyncadd [#allocation8], 4294963200  ;;  %v1416_v0 = vmov 0   ;;  %v1462_v1 = vld [vmem:[#allocation7 + $0x4] ss:$16 sps:$4 sm:$0xff]   ;;  %v1417_v33 = vmov 0.0|0.0  }
  0x27   :  { %280 = vmatprep.mubr.bf16.mxu0 %v1416_v0  ;;  %321 = vmatprep.mubr.bf16.mxu1 %v1416_v0  ;;  %v1464_v2 = vld [vmem:[#allocation7] ss:$16 sps:$4 sm:$0xff]   ;;  %v1467_v3 = vld [vmem:[#allocation7 + $0x24] ss:$16 sps:$4 sm:$0xff]   ;;  %v1470_v4 = vld [vmem:[#allocation7 + $0xc] ss:$16 sps:$4 sm:$0xff]  }
  0x28   :  { %248 = vmatprep.subr.bf16.mxu0 %v1462_v1  ;;  %v1472_v5 = vld [vmem:[#allocation7 + $0x20] ss:$16 sps:$4 sm:$0xff]   ;;  %v1474_v6 = vld [vmem:[#allocation7 + $0x8] ss:$16 sps:$4 sm:$0xff]   ;;  %v1477_v7 = vld [vmem:[#allocation7 + $0x44] ss:$16 sps:$4 sm:$0xff]   ;;  %289 = vmatprep.subr.bf16.mxu1 %v1470_v4 }
  0x29   :  { %249 = vmatpush1.bf16.msra.mxu0 %v1464_v2  ;;  %v1480_v8 = vld [vmem:[#allocation7 + $0x2c] ss:$16 sps:$4 sm:$0xff]   ;;  %290 = vmatpush1.bf16.msra.mxu1 %v1474_v6  ;;  %v1483_v9 = vld [vmem:[#allocation7 + $0x28] ss:$16 sps:$4 sm:$0xff]   ;;  %v1487_v10 = vld [vmem:[#allocation7 + $0x40] ss:$16 sps:$4 sm:$0xff]  }
  0x2a   :  { %250 = vmatprep.subr.bf16.mxu0 %v1467_v3  ;;  %291 = vmatprep.subr.bf16.mxu1 %v1480_v8  ;;  %v1490_v11 = vld [vmem:[#allocation7 + $0x64] ss:$16 sps:$4 sm:$0xff]   ;;  %v1492_v12 = vld [vmem:[#allocation7 + $0x4c] ss:$16 sps:$4 sm:$0xff]   ;;  %v1495_v13 = vld [vmem:[#allocation7 + $0x48] ss:$16 sps:$4 sm:$0xff]  }
  0x2b   :  { %v1499_v14 = vld [vmem:[#allocation7 + $0x60] ss:$16 sps:$4 sm:$0xff]   ;;  %v1501_v15 = vld [vmem:[#allocation7 + $0x6c] ss:$16 sps:$4 sm:$0xff]   ;;  %v1504_v16 = vld [vmem:[#allocation7 + $0x84] ss:$16 sps:$4 sm:$0xff]  }
  0x2c   :  { %v1507_v17 = vld [vmem:[#allocation7 + $0x80] ss:$16 sps:$4 sm:$0xff]   ;;  %v1509_v18 = vld [vmem:[#allocation7 + $0x68] ss:$16 sps:$4 sm:$0xff]   ;;  %v1513_v19 = vld [vmem:[#allocation7 + $0x8c] ss:$16 sps:$4 sm:$0xff]  }
  0x2d   :  { %251 = vmatpush1.bf16.msra.mxu0 %v1472_v5  ;;  %292 = vmatpush1.bf16.msra.mxu1 %v1483_v9  ;;  %v1516_v20 = vld [vmem:[#allocation7 + $0xa4] ss:$16 sps:$4 sm:$0xff]   ;;  %v1519_v21 = vld [vmem:[#allocation7 + $0x88] ss:$16 sps:$4 sm:$0xff]   ;;  %v1523_v22 = vld [vmem:[#allocation7 + $0xa0] ss:$16 sps:$4 sm:$0xff]  }
  0x2e   :  { %252 = vmatprep.subr.bf16.mxu0 %v1477_v7  ;;  %293 = vmatprep.subr.bf16.mxu1 %v1492_v12  ;;  %v1525_v23 = vld [vmem:[#allocation7 + $0xac] ss:$16 sps:$4 sm:$0xff]   ;;  %v1528_v24 = vld [vmem:[#allocation7 + $0xc4] ss:$16 sps:$4 sm:$0xff]   ;;  %v1531_v25 = vld [vmem:[#allocation7 + $0xa8] ss:$16 sps:$4 sm:$0xff]  }
  0x2f   :  { %v1535_v26 = vld [vmem:[#allocation7 + $0xc0] ss:$16 sps:$4 sm:$0xff]   ;;  %v1537_v27 = vld [vmem:[#allocation7 + $0xcc] ss:$16 sps:$4 sm:$0xff]   ;;  %v1540_v28 = vld [vmem:[#allocation7 + $0xe4] ss:$16 sps:$4 sm:$0xff]  }
  0x30   :  { %v1543_v29 = vld [vmem:[#allocation7 + $0xc8] ss:$16 sps:$4 sm:$0xff]   ;;  %v1547_v30 = vld [vmem:[#allocation7 + $0xe0] ss:$16 sps:$4 sm:$0xff]   ;;  %v1549_v31 = vld [vmem:[#allocation7 + $0xec] ss:$16 sps:$4 sm:$0xff]  }
  0x31   :  { %253 = vmatpush1.bf16.msra.mxu0 %v1487_v10  ;;  %294 = vmatpush1.bf16.msra.mxu1 %v1495_v13  ;;  %v1553_v32 = vld [vmem:[#allocation7 + $0xe8] ss:$16 sps:$4 sm:$0xff]   ;;  %v82_v34 = vld [vmem:[#allocation4] sm:$0xff]  ;;  %s1418_s1 = smov [#allocation9]  }
  0x32   :  { %254 = vmatprep.subr.bf16.mxu0 %v1490_v11  ;;  %295 = vmatprep.subr.bf16.mxu1 %v1501_v15  ;;  %v84_v35 = vunpack.c.l.bf16 %v82_v34  ;;  %v83_v36 = vld [vmem:[#allocation4 + $0x8] sm:$0xff]  ;;  %v85_v37 = vunpack.c.h.bf16 %v82_v34  ;;  %s1126_s6 = sshll.u32 %s1418_s1, 4  ;;  %s1127_s6 = int_to_ptr.vmem [resolvable:$true] %s1126_s6 }
  0x33   :  { %v86_v39 = vunpack.c.l.bf16 %v83_v36  ;;  %v87_v50 = vunpack.c.h.bf16 %v83_v36  ;;  %s1384_s7 = scalar_lea.vmem %s1127_s6, 1024  ;;  %p1389_p3 = scmp.lt.s32.totalorder %s1127_s6, %s1127_s6 }
  0x34   :  { %p1385_p2 = scmp.ne.s32.totalorder %s1127_s6, %s1384_s7  ;;  %p1390_p4 = scmp.lt.s32.totalorder %s1384_s7, %s1384_s7 }
  0x35   :  { %255 = vmatpush1.bf16.msra.mxu0 %v1499_v14  ;;  %296 = vmatpush1.bf16.msra.mxu1 %v1509_v18 }
  0x36   :  { %256 = vmatprep.subr.bf16.mxu0 %v1504_v16  ;;  %297 = vmatprep.subr.bf16.mxu1 %v1513_v19  ;;  %p1391_p5 = por %p1390_p4, %p1389_p3 }
  0x38   :  { %p1392_p6 = pnand %p1391_p5, %p1385_p2 }
  0x39   :  { %257 = vmatpush1.bf16.msra.mxu0 %v1507_v17  ;;  %298 = vmatpush1.bf16.msra.mxu1 %v1519_v21 }
  0x3a   :  { %258 = vmatprep.subr.bf16.mxu0 %v1516_v20  ;;  %299 = vmatprep.subr.bf16.mxu1 %v1525_v23 }
  0x3d   :  { %259 = vmatpush1.bf16.msra.mxu0 %v1523_v22  ;;  %300 = vmatpush1.bf16.msra.mxu1 %v1531_v25 }
  0x3e   :  { %260 = vmatprep.subr.bf16.mxu0 %v1528_v24  ;;  %301 = vmatprep.subr.bf16.mxu1 %v1537_v27 }
  0x41   :  { %261 = vmatpush1.bf16.msra.mxu0 %v1535_v26  ;;  %302 = vmatpush1.bf16.msra.mxu1 %v1543_v29 }
  0x42   :  { %262 = vmatprep.subr.bf16.mxu0 %v1540_v28  ;;  %303 = vmatprep.subr.bf16.mxu1 %v1549_v31 }
  0x45   :  { %263 = vmatpush1.bf16.msra.mxu0 %v1547_v30  ;;  %304 = vmatpush1.bf16.msra.mxu1 %v1553_v32 }
  0x46   :  { %357 = vmatprep.subr.bf16.mxu0 %v1462_v1  ;;  %398 = vmatprep.subr.bf16.mxu1 %v1470_v4 }
  0x48   :  { %281 = vmatmul.mubr.bf16.vlgmr.msra.gmra.mrb[0].mxu0 %v1417_v33  ;;  %322 = vmatmul.mubr.bf16.vlgmr.msra.gmra.mrb[0].mxu1 %v1417_v33 }
  0x49   :  { %358 = vmatpush1.bf16.msra.mxu0 %v1464_v2  ;;  %389 = vmatprep.mubr.bf16.mxu0 %v1416_v0 }
  0x4a   :  { %359 = vmatprep.subr.bf16.mxu0 %v1467_v3  ;;  %399 = vmatpush1.bf16.msra.mxu1 %v1474_v6 }
  0x4b   :  { %430 = vmatprep.mubr.bf16.mxu1 %v1416_v0  ;;  %400 = vmatprep.subr.bf16.mxu1 %v1480_v8 }
  0x4d   :  { %360 = vmatpush1.bf16.msra.mxu0 %v1472_v5 }
  0x4e   :  { %361 = vmatprep.subr.bf16.mxu0 %v1477_v7  ;;  %401 = vmatpush1.bf16.msra.mxu1 %v1483_v9 }
  0x4f   :  { %402 = vmatprep.subr.bf16.mxu1 %v1492_v12 }
  0x51   :  { %362 = vmatpush1.bf16.msra.mxu0 %v1487_v10 }
  0x52   :  { %363 = vmatprep.subr.bf16.mxu0 %v1490_v11  ;;  %403 = vmatpush1.bf16.msra.mxu1 %v1495_v13 }
  0x53   :  { %404 = vmatprep.subr.bf16.mxu1 %v1501_v15 }
  0x55   :  { %364 = vmatpush1.bf16.msra.mxu0 %v1499_v14 }
  0x56   :  { %365 = vmatprep.subr.bf16.mxu0 %v1504_v16  ;;  %405 = vmatpush1.bf16.msra.mxu1 %v1509_v18 }
  0x57   :  { %406 = vmatprep.subr.bf16.mxu1 %v1513_v19 }
  0x59   :  { %366 = vmatpush1.bf16.msra.mxu0 %v1507_v17 }
  0x5a   :  { %367 = vmatprep.subr.bf16.mxu0 %v1516_v20  ;;  %407 = vmatpush1.bf16.msra.mxu1 %v1519_v21 }
  0x5b   :  { %408 = vmatprep.subr.bf16.mxu1 %v1525_v23 }
  0x5d   :  { %368 = vmatpush1.bf16.msra.mxu0 %v1523_v22 }
  0x5e   :  { %369 = vmatprep.subr.bf16.mxu0 %v1528_v24  ;;  %409 = vmatpush1.bf16.msra.mxu1 %v1531_v25 }
  0x5f   :  { %410 = vmatprep.subr.bf16.mxu1 %v1537_v27 }
  0x61   :  { %370 = vmatpush1.bf16.msra.mxu0 %v1535_v26 }
  0x62   :  { %371 = vmatprep.subr.bf16.mxu0 %v1540_v28  ;;  %411 = vmatpush1.bf16.msra.mxu1 %v1543_v29 }
  0x63   :  { %412 = vmatprep.subr.bf16.mxu1 %v1549_v31 }
  0x65   :  { %372 = vmatpush1.bf16.msra.mxu0 %v1547_v30 }
  0x66   :  { %467 = vmatprep.subr.bf16.mxu0 %v1462_v1  ;;  %413 = vmatpush1.bf16.msra.mxu1 %v1553_v32 }
  0x67   :  { %508 = vmatprep.subr.bf16.mxu1 %v1470_v4 }
 0x11b   :  { %v282_v38 = vpop.f32.mrb[0].mxu0  ;;  %v323_v46 = vpop.f32.mrb[0].mxu1 }
 0x11c   :  { %v283_v40 = vadd.f32 %v282_v38, %v84_v35  ;;  %v284_v41 = vpop.f32.mrb[1].mxu0  ;;  %v324_v48 = vadd.f32 %v323_v46, %v86_v39  ;;  %v325_v49 = vpop.f32.mrb[1].mxu1 }
 0x11d   :  { %v285_v42 = vadd.f32 %v284_v41, %v85_v37  ;;  %v286_v43 = vpop.f32.mrb[2].mxu0  ;;  %v327_v51 = vpop.f32.mrb[2].mxu1  ;;  %v326_v53 = vadd.f32 %v325_v49, %v87_v50 }
 0x11e   :  { %v330_v44 = vmul.f32 0.5, %v283_v40  ;;  %v287_v45 = vpop.f32.mrb[3].mxu0  ;;  %v328_v52 = vpop.f32.mrb[3].mxu1  ;;  %v351_v40 = vld [vmem:[#allocation4 + $0x10] sm:$0xff] }
 0x11f   :  { %v334_v47 = vmul.f32 0.5, %v285_v42  ;;  %v339_v54 = vmul.f32 0.5, %v326_v53  ;;  %v353_v41 = vunpack.c.l.bf16 %v351_v40  ;;  %v352_v42 = vld [vmem:[#allocation4 + $0x18] sm:$0xff]  ;;  %v354_v43 = vunpack.c.h.bf16 %v351_v40 }
 0x120   :  { %1228 = vtanh.f32 %v330_v44 }
 0x121   :  { %1230 = vtanh.f32 %v334_v47  ;;  %v355_v47 = vunpack.c.l.bf16 %v352_v42 }
 0x122   :  { %1232 = vtanh.f32 %v324_v48 }
 0x123   :  { %1234 = vtanh.f32 %v339_v54 }
 0x12a   :  { %v1229_v55 = vpop.eup %1228 }
 0x12b   :  { %v1231_v56 = vpop.eup %1230  ;;  %v332_v57 = vmul.f32 0.5, %v1229_v55 }
 0x12c   :  { %v1233_v58 = vpop.eup %1232  ;;  %v336_v59 = vmul.f32 0.5, %v1231_v56 }
 0x12d   :  { %v333_v60 = vadd.f32 0.5, %v332_v57  ;;  %v1235_v34 = vpop.eup %1234 }
 0x12e   :  { %v337_v61 = vadd.f32 0.5, %v336_v59  ;;  %v341_v35 = vmul.f32 0.5, %v1235_v34 }
 0x12f   :  { %v344_v62 = vmul.f32 %v1233_v58, %v333_v60  ;;  %v356_v58 = vunpack.c.h.bf16 %v352_v42 }
 0x130   :  { %v343_v63 = vmul.f32 0.0, %v337_v61  ;;  %v342_v36 = vadd.f32 0.5, %v341_v35 }
 0x132   :  { %v1594_v33 = vadd.f32 %v344_v62, %v343_v63 }
 0x134   :  { %1236 = vtanh.f32 %v1594_v33 }
 0x13e   :  { %v1237_v37 = vpop.eup %1236 }
 0x13f   :  { %v347_v38 = vmul.f32 %v1237_v37, %v342_v36 }
 0x141   :  { %348 = vst [vmem:[#allocation9] sm:$0xff] %v347_v38  ;;  %v349_v39 = vpack.c.bf16 %v347_v38, %v347_v38 }
 0x143   :  { %390 = vmatmul.mubr.bf16.vlgmr.msra.gmra.mrb[4].mxu0 %v349_v39  ;;  %431 = vmatmul.mubr.bf16.vlgmr.msra.gmra.mrb[4].mxu1 %v349_v39 }
 0x144   :  { %468 = vmatpush1.bf16.msra.mxu0 %v1464_v2  ;;  %509 = vmatpush1.bf16.msra.mxu1 %v1474_v6 }
 0x145   :  { %469 = vmatprep.subr.bf16.mxu0 %v1467_v3  ;;  %510 = vmatprep.subr.bf16.mxu1 %v1480_v8 }
 0x146   :  { %499 = vmatprep.mubr.bf16.mxu0 %v1416_v0  ;;  %540 = vmatprep.mubr.bf16.mxu1 %v1416_v0 }
 0x148   :  { %470 = vmatpush1.bf16.msra.mxu0 %v1472_v5  ;;  %511 = vmatpush1.bf16.msra.mxu1 %v1483_v9 }
 0x149   :  { %471 = vmatprep.subr.bf16.mxu0 %v1477_v7  ;;  %512 = vmatprep.subr.bf16.mxu1 %v1492_v12 }
 0x14c   :  { %472 = vmatpush1.bf16.msra.mxu0 %v1487_v10  ;;  %513 = vmatpush1.bf16.msra.mxu1 %v1495_v13 }
 0x14d   :  { %473 = vmatprep.subr.bf16.mxu0 %v1490_v11  ;;  %514 = vmatprep.subr.bf16.mxu1 %v1501_v15 }
 0x150   :  { %474 = vmatpush1.bf16.msra.mxu0 %v1499_v14  ;;  %515 = vmatpush1.bf16.msra.mxu1 %v1509_v18 }
 0x151   :  { %475 = vmatprep.subr.bf16.mxu0 %v1504_v16  ;;  %516 = vmatprep.subr.bf16.mxu1 %v1513_v19 }
 0x154   :  { %476 = vmatpush1.bf16.msra.mxu0 %v1507_v17  ;;  %517 = vmatpush1.bf16.msra.mxu1 %v1519_v21 }
 0x155   :  { %477 = vmatprep.subr.bf16.mxu0 %v1516_v20  ;;  %518 = vmatprep.subr.bf16.mxu1 %v1525_v23 }
 0x158   :  { %478 = vmatpush1.bf16.msra.mxu0 %v1523_v22  ;;  %519 = vmatpush1.bf16.msra.mxu1 %v1531_v25 }
 0x159   :  { %479 = vmatprep.subr.bf16.mxu0 %v1528_v24  ;;  %520 = vmatprep.subr.bf16.mxu1 %v1537_v27 }
 0x15c   :  { %480 = vmatpush1.bf16.msra.mxu0 %v1535_v26  ;;  %521 = vmatpush1.bf16.msra.mxu1 %v1543_v29 }
 0x15d   :  { %481 = vmatprep.subr.bf16.mxu0 %v1540_v28  ;;  %522 = vmatprep.subr.bf16.mxu1 %v1549_v31 }
 0x160   :  { %482 = vmatpush1.bf16.msra.mxu0 %v1547_v30  ;;  %523 = vmatpush1.bf16.msra.mxu1 %v1553_v32 }
 0x161   :  { %577 = vmatprep.subr.bf16.mxu0 %v1462_v1  ;;  %618 = vmatprep.subr.bf16.mxu1 %v1470_v4 }
 0x216   :  { %v391_v44 = vpop.f32.mrb[4].mxu0  ;;  %v432_v45 = vpop.f32.mrb[4].mxu1 }
 0x217   :  { %v392_v46 = vadd.f32 %v391_v44, %v353_v41  ;;  %v393_v48 = vpop.f32.mrb[5].mxu0  ;;  %v434_v49 = vpop.f32.mrb[5].mxu1  ;;  %v433_v57 = vadd.f32 %v432_v45, %v355_v47 }
 0x218   :  { %v394_v50 = vadd.f32 %v393_v48, %v354_v43  ;;  %v395_v51 = vpop.f32.mrb[6].mxu0  ;;  %v436_v52 = vpop.f32.mrb[6].mxu1  ;;  %v435_v59 = vadd.f32 %v434_v49, %v356_v58  ;;  %v462_v48 = vld [vmem:[#allocation4 + $0x28] sm:$0xff] }
 0x219   :  { %v439_v53 = vmul.f32 0.5, %v392_v46  ;;  %v396_v54 = vpop.f32.mrb[7].mxu0  ;;  %v437_v55 = vpop.f32.mrb[7].mxu1 }
 0x21a   :  { %v443_v56 = vmul.f32 0.5, %v394_v50  ;;  %v448_v60 = vmul.f32 0.5, %v435_v59 }
 0x21b   :  { %1238 = vtanh.f32 %v439_v53  ;;  %v465_v53 = vunpack.c.l.bf16 %v462_v48 }
 0x21c   :  { %1240 = vtanh.f32 %v443_v56 }
 0x21d   :  { %1242 = vtanh.f32 %v433_v57 }
 0x21e   :  { %1244 = vtanh.f32 %v448_v60 }
 0x225   :  { %v1239_v61 = vpop.eup %1238 }
 0x226   :  { %v1241_v62 = vpop.eup %1240  ;;  %v441_v63 = vmul.f32 0.5, %v1239_v61 }
 0x227   :  { %v445_v34 = vmul.f32 0.5, %v1241_v62  ;;  %v1243_v36 = vpop.eup %1242 }
 0x228   :  { %v442_v35 = vadd.f32 0.5, %v441_v63  ;;  %v1245_v41 = vpop.eup %1244 }
 0x229   :  { %v446_v37 = vadd.f32 0.5, %v445_v34  ;;  %v450_v42 = vmul.f32 0.5, %v1245_v41  ;;  %v466_v34 = vunpack.c.h.bf16 %v462_v48 }
 0x22a   :  { %v453_v38 = vmul.f32 %v1243_v36, %v442_v35 }
 0x22b   :  { %v452_v39 = vmul.f32 %v446_v37, %v1594_v33  ;;  %v451_v43 = vadd.f32 0.5, %v450_v42  ;;  %v461_v33 = vld [vmem:[#allocation4 + $0x20] sm:$0xff] }
 0x22c   :  { %v463_v47 = vunpack.c.l.bf16 %v461_v33  ;;  %v464_v49 = vunpack.c.h.bf16 %v461_v33 }
 0x22d   :  { %v1632_v40 = vadd.f32 %v453_v38, %v452_v39 }
 0x22f   :  { %1246 = vtanh.f32 %v1632_v40 }
 0x239   :  { %v1247_v44 = vpop.eup %1246 }
 0x23a   :  { %v456_v45 = vmul.f32 %v1247_v44, %v451_v43 }
 0x23c   :  { %458 = vst [vmem:[#allocation9 + $0x8] sm:$0xff] %v456_v45  ;;  %v459_v46 = vpack.c.bf16 %v456_v45, %v456_v45 }
 0x23e   :  { %500 = vmatmul.mubr.bf16.vlgmr.msra.gmra.mrb[8].mxu0 %v459_v46  ;;  %541 = vmatmul.mubr.bf16.vlgmr.msra.gmra.mrb[8].mxu1 %v459_v46 }
 0x23f   :  { %578 = vmatpush1.bf16.msra.mxu0 %v1464_v2  ;;  %619 = vmatpush1.bf16.msra.mxu1 %v1474_v6 }
 0x240   :  { %579 = vmatprep.subr.bf16.mxu0 %v1467_v3  ;;  %620 = vmatprep.subr.bf16.mxu1 %v1480_v8 }
 0x241   :  { %609 = vmatprep.mubr.bf16.mxu0 %v1416_v0  ;;  %650 = vmatprep.mubr.bf16.mxu1 %v1416_v0 }
 0x243   :  { %580 = vmatpush1.bf16.msra.mxu0 %v1472_v5  ;;  %621 = vmatpush1.bf16.msra.mxu1 %v1483_v9 }
 0x244   :  { %581 = vmatprep.subr.bf16.mxu0 %v1477_v7  ;;  %622 = vmatprep.subr.bf16.mxu1 %v1492_v12 }
 0x247   :  { %582 = vmatpush1.bf16.msra.mxu0 %v1487_v10  ;;  %623 = vmatpush1.bf16.msra.mxu1 %v1495_v13 }
 0x248   :  { %583 = vmatprep.subr.bf16.mxu0 %v1490_v11  ;;  %624 = vmatprep.subr.bf16.mxu1 %v1501_v15 }
 0x24b   :  { %584 = vmatpush1.bf16.msra.mxu0 %v1499_v14  ;;  %625 = vmatpush1.bf16.msra.mxu1 %v1509_v18 }
 0x24c   :  { %585 = vmatprep.subr.bf16.mxu0 %v1504_v16  ;;  %626 = vmatprep.subr.bf16.mxu1 %v1513_v19 }
 0x24f   :  { %586 = vmatpush1.bf16.msra.mxu0 %v1507_v17  ;;  %627 = vmatpush1.bf16.msra.mxu1 %v1519_v21 }
 0x250   :  { %587 = vmatprep.subr.bf16.mxu0 %v1516_v20  ;;  %628 = vmatprep.subr.bf16.mxu1 %v1525_v23 }
 0x253   :  { %588 = vmatpush1.bf16.msra.mxu0 %v1523_v22  ;;  %629 = vmatpush1.bf16.msra.mxu1 %v1531_v25 }
 0x254   :  { %589 = vmatprep.subr.bf16.mxu0 %v1528_v24  ;;  %630 = vmatprep.subr.bf16.mxu1 %v1537_v27 }
 0x257   :  { %590 = vmatpush1.bf16.msra.mxu0 %v1535_v26  ;;  %631 = vmatpush1.bf16.msra.mxu1 %v1543_v29 }
 0x258   :  { %591 = vmatprep.subr.bf16.mxu0 %v1540_v28  ;;  %632 = vmatprep.subr.bf16.mxu1 %v1549_v31 }
 0x25b   :  { %592 = vmatpush1.bf16.msra.mxu0 %v1547_v30  ;;  %633 = vmatpush1.bf16.msra.mxu1 %v1553_v32 }
 0x25c   :  { %687 = vmatprep.subr.bf16.mxu0 %v1462_v1  ;;  %728 = vmatprep.subr.bf16.mxu1 %v1470_v4 }
 0x311   :  { %v501_v50 = vpop.f32.mrb[8].mxu0  ;;  %v542_v51 = vpop.f32.mrb[8].mxu1 }
 0x312   :  { %v502_v52 = vadd.f32 %v501_v50, %v463_v47  ;;  %v503_v54 = vpop.f32.mrb[9].mxu0  ;;  %v544_v55 = vpop.f32.mrb[9].mxu1  ;;  %v543_v63 = vadd.f32 %v542_v51, %v465_v53 }
 0x313   :  { %v504_v56 = vadd.f32 %v503_v54, %v464_v49  ;;  %v505_v57 = vpop.f32.mrb[10].mxu0  ;;  %v546_v58 = vpop.f32.mrb[10].mxu1  ;;  %v545_v35 = vadd.f32 %v544_v55, %v466_v34  ;;  %v572_v54 = vld [vmem:[#allocation4 + $0x38] sm:$0xff] }
 0x314   :  { %v549_v59 = vmul.f32 0.5, %v502_v52  ;;  %v506_v60 = vpop.f32.mrb[11].mxu0  ;;  %v547_v61 = vpop.f32.mrb[11].mxu1 }
 0x315   :  { %v553_v62 = vmul.f32 0.5, %v504_v56  ;;  %v558_v36 = vmul.f32 0.5, %v545_v35 }
 0x316   :  { %1248 = vtanh.f32 %v549_v59  ;;  %v575_v59 = vunpack.c.l.bf16 %v572_v54 }
 0x317   :  { %1250 = vtanh.f32 %v553_v62 }
 0x318   :  { %1252 = vtanh.f32 %v543_v63 }
 0x319   :  { %1254 = vtanh.f32 %v558_v36 }
 0x320   :  { %v1249_v37 = vpop.eup %1248 }
 0x321   :  { %v1251_v38 = vpop.eup %1250  ;;  %v551_v39 = vmul.f32 0.5, %v1249_v37 }
 0x322   :  { %v555_v41 = vmul.f32 0.5, %v1251_v38  ;;  %v1253_v43 = vpop.eup %1252 }
 0x323   :  { %v552_v42 = vadd.f32 0.5, %v551_v39  ;;  %v1255_v47 = vpop.eup %1254 }
 0x324   :  { %v556_v44 = vadd.f32 0.5, %v555_v41  ;;  %v560_v48 = vmul.f32 0.5, %v1255_v47  ;;  %v576_v41 = vunpack.c.h.bf16 %v572_v54 }
 0x325   :  { %v563_v45 = vmul.f32 %v1253_v43, %v552_v42 }
 0x326   :  { %v562_v46 = vmul.f32 %v556_v44, %v1632_v40  ;;  %v561_v49 = vadd.f32 0.5, %v560_v48  ;;  %v571_v40 = vld [vmem:[#allocation4 + $0x30] sm:$0xff] }
 0x327   :  { %v573_v53 = vunpack.c.l.bf16 %v571_v40  ;;  %v574_v55 = vunpack.c.h.bf16 %v571_v40 }
 0x328   :  { %v1670_v33 = vadd.f32 %v563_v45, %v562_v46 }
 0x32a   :  { %1256 = vtanh.f32 %v1670_v33 }
 0x334   :  { %v1257_v50 = vpop.eup %1256 }
 0x335   :  { %v566_v51 = vmul.f32 %v1257_v50, %v561_v49 }
 0x337   :  { %568 = vst [vmem:[#allocation9 + $0x10] sm:$0xff] %v566_v51  ;;  %v569_v52 = vpack.c.bf16 %v566_v51, %v566_v51 }
 0x339   :  { %610 = vmatmul.mubr.bf16.vlgmr.msra.gmra.mrb[12].mxu0 %v569_v52  ;;  %651 = vmatmul.mubr.bf16.vlgmr.msra.gmra.mrb[12].mxu1 %v569_v52 }
 0x33a   :  { %688 = vmatpush1.bf16.msra.mxu0 %v1464_v2  ;;  %729 = vmatpush1.bf16.msra.mxu1 %v1474_v6 }
 0x33b   :  { %689 = vmatprep.subr.bf16.mxu0 %v1467_v3  ;;  %730 = vmatprep.subr.bf16.mxu1 %v1480_v8 }
 0x33c   :  { %719 = vmatprep.mubr.bf16.mxu0 %v1416_v0  ;;  %760 = vmatprep.mubr.bf16.mxu1 %v1416_v0 }
 0x33e   :  { %690 = vmatpush1.bf16.msra.mxu0 %v1472_v5  ;;  %731 = vmatpush1.bf16.msra.mxu1 %v1483_v9 }
 0x33f   :  { %691 = vmatprep.subr.bf16.mxu0 %v1477_v7  ;;  %732 = vmatprep.subr.bf16.mxu1 %v1492_v12 }
 0x342   :  { %692 = vmatpush1.bf16.msra.mxu0 %v1487_v10  ;;  %733 = vmatpush1.bf16.msra.mxu1 %v1495_v13 }
 0x343   :  { %693 = vmatprep.subr.bf16.mxu0 %v1490_v11  ;;  %734 = vmatprep.subr.bf16.mxu1 %v1501_v15 }
 0x346   :  { %694 = vmatpush1.bf16.msra.mxu0 %v1499_v14  ;;  %735 = vmatpush1.bf16.msra.mxu1 %v1509_v18 }
 0x347   :  { %695 = vmatprep.subr.bf16.mxu0 %v1504_v16  ;;  %736 = vmatprep.subr.bf16.mxu1 %v1513_v19 }
 0x34a   :  { %696 = vmatpush1.bf16.msra.mxu0 %v1507_v17  ;;  %737 = vmatpush1.bf16.msra.mxu1 %v1519_v21 }
 0x34b   :  { %697 = vmatprep.subr.bf16.mxu0 %v1516_v20  ;;  %738 = vmatprep.subr.bf16.mxu1 %v1525_v23 }
 0x34e   :  { %698 = vmatpush1.bf16.msra.mxu0 %v1523_v22  ;;  %739 = vmatpush1.bf16.msra.mxu1 %v1531_v25 }
 0x34f   :  { %699 = vmatprep.subr.bf16.mxu0 %v1528_v24  ;;  %740 = vmatprep.subr.bf16.mxu1 %v1537_v27 }
 0x352   :  { %700 = vmatpush1.bf16.msra.mxu0 %v1535_v26  ;;  %741 = vmatpush1.bf16.msra.mxu1 %v1543_v29 }
 0x353   :  { %701 = vmatprep.subr.bf16.mxu0 %v1540_v28  ;;  %742 = vmatprep.subr.bf16.mxu1 %v1549_v31 }
 0x356   :  { %702 = vmatpush1.bf16.msra.mxu0 %v1547_v30  ;;  %743 = vmatpush1.bf16.msra.mxu1 %v1553_v32 }
 0x357   :  { %797 = vmatprep.subr.bf16.mxu0 %v1462_v1  ;;  %838 = vmatprep.subr.bf16.mxu1 %v1470_v4 }
 0x40c   :  { %v611_v56 = vpop.f32.mrb[12].mxu0  ;;  %v652_v57 = vpop.f32.mrb[12].mxu1 }
 0x40d   :  { %v612_v58 = vadd.f32 %v611_v56, %v573_v53  ;;  %v613_v60 = vpop.f32.mrb[13].mxu0  ;;  %v654_v61 = vpop.f32.mrb[13].mxu1  ;;  %v653_v39 = vadd.f32 %v652_v57, %v575_v59 }
 0x40e   :  { %v614_v62 = vadd.f32 %v613_v60, %v574_v55  ;;  %v615_v63 = vpop.f32.mrb[14].mxu0  ;;  %v656_v34 = vpop.f32.mrb[14].mxu1  ;;  %v655_v42 = vadd.f32 %v654_v61, %v576_v41  ;;  %v682_v60 = vld [vmem:[#allocation4 + $0x48] sm:$0xff] }
 0x40f   :  { %v659_v35 = vmul.f32 0.5, %v612_v58  ;;  %v616_v36 = vpop.f32.mrb[15].mxu0  ;;  %v657_v37 = vpop.f32.mrb[15].mxu1 }
 0x410   :  { %v663_v38 = vmul.f32 0.5, %v614_v62  ;;  %v668_v43 = vmul.f32 0.5, %v655_v42 }
 0x411   :  { %1258 = vtanh.f32 %v659_v35  ;;  %v685_v35 = vunpack.c.l.bf16 %v682_v60 }
 0x412   :  { %1260 = vtanh.f32 %v663_v38 }
 0x413   :  { %1262 = vtanh.f32 %v653_v39 }
 0x414   :  { %1264 = vtanh.f32 %v668_v43 }
 0x41b   :  { %v1259_v44 = vpop.eup %1258 }
 0x41c   :  { %v1261_v45 = vpop.eup %1260  ;;  %v661_v46 = vmul.f32 0.5, %v1259_v44 }
 0x41d   :  { %v665_v47 = vmul.f32 0.5, %v1261_v45  ;;  %v1263_v49 = vpop.eup %1262 }
 0x41e   :  { %v662_v48 = vadd.f32 0.5, %v661_v46  ;;  %v1265_v53 = vpop.eup %1264 }
 0x41f   :  { %v666_v50 = vadd.f32 0.5, %v665_v47  ;;  %v670_v54 = vmul.f32 0.5, %v1265_v53 }
 0x420   :  { %v673_v51 = vmul.f32 %v1263_v49, %v662_v48 }
 0x421   :  { %v672_v52 = vmul.f32 %v666_v50, %v1670_v33  ;;  %v671_v55 = vadd.f32 0.5, %v670_v54  ;;  %v681_v33 = vld [vmem:[#allocation4 + $0x40] sm:$0xff] }
 0x422   :  { %v683_v59 = vunpack.c.l.bf16 %v681_v33  ;;  %v684_v61 = vunpack.c.h.bf16 %v681_v33 }
 0x423   :  { %v1708_v40 = vadd.f32 %v673_v51, %v672_v52 }
 0x425   :  { %1266 = vtanh.f32 %v1708_v40 }
 0x42f   :  { %v1267_v56 = vpop.eup %1266 }
 0x430   :  { %v676_v57 = vmul.f32 %v1267_v56, %v671_v55 }
 0x432   :  { %678 = vst [vmem:[#allocation9 + $0x18] sm:$0xff] %v676_v57  ;;  %v679_v58 = vpack.c.bf16 %v676_v57, %v676_v57 }
 0x434   :  { %720 = vmatmul.mubr.bf16.vlgmr.msra.gmra.mrb[16].mxu0 %v679_v58  ;;  %761 = vmatmul.mubr.bf16.vlgmr.msra.gmra.mrb[16].mxu1 %v679_v58 }
 0x435   :  { %798 = vmatpush1.bf16.msra.mxu0 %v1464_v2  ;;  %839 = vmatpush1.bf16.msra.mxu1 %v1474_v6 }
 0x436   :  { %799 = vmatprep.subr.bf16.mxu0 %v1467_v3  ;;  %840 = vmatprep.subr.bf16.mxu1 %v1480_v8 }
 0x437   :  { %829 = vmatprep.mubr.bf16.mxu0 %v1416_v0  ;;  %870 = vmatprep.mubr.bf16.mxu1 %v1416_v0 }
 0x439   :  { %800 = vmatpush1.bf16.msra.mxu0 %v1472_v5  ;;  %841 = vmatpush1.bf16.msra.mxu1 %v1483_v9 }
 0x43a   :  { %801 = vmatprep.subr.bf16.mxu0 %v1477_v7  ;;  %842 = vmatprep.subr.bf16.mxu1 %v1492_v12 }
 0x43d   :  { %802 = vmatpush1.bf16.msra.mxu0 %v1487_v10  ;;  %843 = vmatpush1.bf16.msra.mxu1 %v1495_v13 }
 0x43e   :  { %803 = vmatprep.subr.bf16.mxu0 %v1490_v11  ;;  %844 = vmatprep.subr.bf16.mxu1 %v1501_v15 }
 0x441   :  { %804 = vmatpush1.bf16.msra.mxu0 %v1499_v14  ;;  %845 = vmatpush1.bf16.msra.mxu1 %v1509_v18 }
 0x442   :  { %805 = vmatprep.subr.bf16.mxu0 %v1504_v16  ;;  %846 = vmatprep.subr.bf16.mxu1 %v1513_v19 }
 0x445   :  { %806 = vmatpush1.bf16.msra.mxu0 %v1507_v17  ;;  %847 = vmatpush1.bf16.msra.mxu1 %v1519_v21 }
 0x446   :  { %807 = vmatprep.subr.bf16.mxu0 %v1516_v20  ;;  %848 = vmatprep.subr.bf16.mxu1 %v1525_v23 }
 0x449   :  { %808 = vmatpush1.bf16.msra.mxu0 %v1523_v22  ;;  %849 = vmatpush1.bf16.msra.mxu1 %v1531_v25 }
 0x44a   :  { %809 = vmatprep.subr.bf16.mxu0 %v1528_v24  ;;  %850 = vmatprep.subr.bf16.mxu1 %v1537_v27 }
 0x44d   :  { %810 = vmatpush1.bf16.msra.mxu0 %v1535_v26  ;;  %851 = vmatpush1.bf16.msra.mxu1 %v1543_v29 }
 0x44e   :  { %811 = vmatprep.subr.bf16.mxu0 %v1540_v28  ;;  %852 = vmatprep.subr.bf16.mxu1 %v1549_v31 }
 0x451   :  { %812 = vmatpush1.bf16.msra.mxu0 %v1547_v30  ;;  %853 = vmatpush1.bf16.msra.mxu1 %v1553_v32 }
 0x452   :  { %907 = vmatprep.subr.bf16.mxu0 %v1462_v1  ;;  %948 = vmatprep.subr.bf16.mxu1 %v1470_v4  ;;  %v686_v4 = vunpack.c.h.bf16 %v682_v60 }
 0x507   :  { %v721_v62 = vpop.f32.mrb[16].mxu0  ;;  %v762_v63 = vpop.f32.mrb[16].mxu1 }
 0x508   :  { %v722_v34 = vadd.f32 %v721_v62, %v683_v59  ;;  %v723_v36 = vpop.f32.mrb[17].mxu0  ;;  %v764_v37 = vpop.f32.mrb[17].mxu1  ;;  %v763_v1 = vadd.f32 %v762_v63, %v685_v35 }
 0x509   :  { %v724_v38 = vadd.f32 %v723_v36, %v684_v61  ;;  %v725_v39 = vpop.f32.mrb[18].mxu0  ;;  %v766_v41 = vpop.f32.mrb[18].mxu1  ;;  %v765_v46 = vadd.f32 %v764_v37, %v686_v4  ;;  %v1315_v4 = vld [vmem:[#allocation7 + $0x28] ss:$16 sps:$4 sm:$0xff]  }
 0x50a   :  { %v769_v42 = vmul.f32 0.5, %v722_v34  ;;  %v726_v43 = vpop.f32.mrb[19].mxu0  ;;  %v767_v44 = vpop.f32.mrb[19].mxu1 }
 0x50b   :  { %v773_v45 = vmul.f32 0.5, %v724_v38  ;;  %v778_v47 = vmul.f32 0.5, %v765_v46  ;;  %v1311_v43 = vld [vmem:[#allocation7 + $0x8] ss:$16 sps:$4 sm:$0xff]   ;;  %v1312_v44 = vld [vmem:[#allocation7 + $0x24] ss:$16 sps:$4 sm:$0xff]  }
 0x50c   :  { %1268 = vtanh.f32 %v769_v42  ;;  %v1310_v42 = vld [vmem:[#allocation7] ss:$16 sps:$4 sm:$0xff]   ;;  %v1316_v46 = vld [vmem:[#allocation7 + $0x44] ss:$16 sps:$4 sm:$0xff]  }
 0x50d   :  { %1270 = vtanh.f32 %v773_v45  ;;  %v1313_v45 = vld [vmem:[#allocation7 + $0x2c] ss:$16 sps:$4 sm:$0xff]  }
 0x50e   :  { %1272 = vtanh.f32 %v763_v1  ;;  %v1314_v1 = vld [vmem:[#allocation7 + $0x20] ss:$16 sps:$4 sm:$0xff]  }
 0x50f   :  { %1274 = vtanh.f32 %v778_v47  ;;  %v1317_v47 = vld [vmem:[#allocation7 + $0x4c] ss:$16 sps:$4 sm:$0xff]  }
 0x516   :  { %v1269_v48 = vpop.eup %1268 }
 0x517   :  { %v1271_v49 = vpop.eup %1270  ;;  %v771_v50 = vmul.f32 0.5, %v1269_v48  ;;  %v1318_v48 = vld [vmem:[#allocation7 + $0x40] ss:$16 sps:$4 sm:$0xff]  }
 0x518   :  { %v775_v51 = vmul.f32 0.5, %v1271_v49  ;;  %v1273_v53 = vpop.eup %1272  ;;  %v1319_v49 = vld [vmem:[#allocation7 + $0x48] ss:$16 sps:$4 sm:$0xff]  }
 0x519   :  { %v772_v52 = vadd.f32 0.5, %v771_v50  ;;  %v1275_v58 = vpop.eup %1274  ;;  %v1320_v50 = vld [vmem:[#allocation7 + $0x64] ss:$16 sps:$4 sm:$0xff]  }
 0x51a   :  { %v776_v54 = vadd.f32 0.5, %v775_v51  ;;  %v780_v33 = vmul.f32 0.5, %v1275_v58  ;;  %v1321_v51 = vld [vmem:[#allocation7 + $0x6c] ss:$16 sps:$4 sm:$0xff]  }
 0x51b   :  { %v783_v55 = vmul.f32 %v1273_v53, %v772_v52  ;;  %v1322_v52 = vld [vmem:[#allocation7 + $0x60] ss:$16 sps:$4 sm:$0xff]   ;;  %v1323_v53 = vld [vmem:[#allocation7 + $0x68] ss:$16 sps:$4 sm:$0xff]   ;;  %v1329_v58 = vld [vmem:[#allocation7 + $0xac] ss:$16 sps:$4 sm:$0xff]  }
 0x51c   :  { %v782_v56 = vmul.f32 %v776_v54, %v1708_v40  ;;  %v781_v59 = vadd.f32 0.5, %v780_v33  ;;  %v1325_v54 = vld [vmem:[#allocation7 + $0x8c] ss:$16 sps:$4 sm:$0xff]   ;;  %v1330_v33 = vld [vmem:[#allocation7 + $0xa0] ss:$16 sps:$4 sm:$0xff]  }
 0x51e   :  { %v1746_v57 = vadd.f32 %v783_v55, %v782_v56  ;;  %v1326_v55 = vld [vmem:[#allocation7 + $0x80] ss:$16 sps:$4 sm:$0xff]   ;;  %v1327_v56 = vld [vmem:[#allocation7 + $0x88] ss:$16 sps:$4 sm:$0xff]  }
 0x520   :  { %1276 = vtanh.f32 %v1746_v57 }
 0x52a   :  { %v1277_v60 = vpop.eup %1276 }
 0x52b   :  { %v786_v61 = vmul.f32 %v1277_v60, %v781_v59  ;;  %v1331_v59 = vld [vmem:[#allocation7 + $0xa8] ss:$16 sps:$4 sm:$0xff]   ;;  %v1332_v60 = vld [vmem:[#allocation7 + $0xc4] ss:$16 sps:$4 sm:$0xff]  }
 0x52d   :  { %788 = vst [vmem:[#allocation9 + $0x20] sm:$0xff] %v786_v61  ;;  %v789_v62 = vpack.c.bf16 %v786_v61, %v786_v61  ;;  %v1333_v61 = vld [vmem:[#allocation7 + $0xcc] ss:$16 sps:$4 sm:$0xff]  }
 0x52f   :  { %830 = vmatmul.mubr.bf16.vlgmr.msra.gmra.mrb[20].mxu0 %v789_v62  ;;  %871 = vmatmul.mubr.bf16.vlgmr.msra.gmra.mrb[20].mxu1 %v789_v62  ;;  %v1334_v62 = vld [vmem:[#allocation7 + $0xc0] ss:$16 sps:$4 sm:$0xff]  }
 0x530   :  { %908 = vmatpush1.bf16.msra.mxu0 %v1464_v2  ;;  %949 = vmatpush1.bf16.msra.mxu1 %v1474_v6  ;;  %v1308_v2 = vld [vmem:[#allocation7 + $0x4] ss:$16 sps:$4 sm:$0xff]  }
 0x531   :  { %909 = vmatprep.subr.bf16.mxu0 %v1467_v3  ;;  %950 = vmatprep.subr.bf16.mxu1 %v1480_v8  ;;  %v1309_v3 = vld [vmem:[#allocation7 + $0xc] ss:$16 sps:$4 sm:$0xff]  }
 0x532   :  { %939 = vmatprep.mubr.bf16.mxu0 %v1416_v0  ;;  %980 = vmatprep.mubr.bf16.mxu1 %v1416_v0 }
 0x534   :  { %910 = vmatpush1.bf16.msra.mxu0 %v1472_v5  ;;  %951 = vmatpush1.bf16.msra.mxu1 %v1483_v9  ;;  %v791_v5 = vld [vmem:[#allocation4 + $0x50] sm:$0xff] }
 0x535   :  { %911 = vmatprep.subr.bf16.mxu0 %v1477_v7  ;;  %952 = vmatprep.subr.bf16.mxu1 %v1492_v12  ;;  %v793_v6 = vunpack.c.l.bf16 %v791_v5  ;;  %v792_v7 = vld [vmem:[#allocation4 + $0x58] sm:$0xff]  ;;  %v794_v8 = vunpack.c.h.bf16 %v791_v5 }
 0x536   :  { %v795_v12 = vunpack.c.l.bf16 %v792_v7  ;;  %v1337_v5 = vld [vmem:[#allocation7 + $0xec] ss:$16 sps:$4 sm:$0xff]  }
 0x538   :  { %912 = vmatpush1.bf16.msra.mxu0 %v1487_v10  ;;  %953 = vmatpush1.bf16.msra.mxu1 %v1495_v13 }
 0x539   :  { %913 = vmatprep.subr.bf16.mxu0 %v1490_v11  ;;  %954 = vmatprep.subr.bf16.mxu1 %v1501_v15 }
 0x53c   :  { %914 = vmatpush1.bf16.msra.mxu0 %v1499_v14  ;;  %955 = vmatpush1.bf16.msra.mxu1 %v1509_v18 }
 0x53d   :  { %915 = vmatprep.subr.bf16.mxu0 %v1504_v16  ;;  %956 = vmatprep.subr.bf16.mxu1 %v1513_v19 }
 0x540   :  { %916 = vmatpush1.bf16.msra.mxu0 %v1507_v17  ;;  %957 = vmatpush1.bf16.msra.mxu1 %v1519_v21 }
 0x541   :  { %917 = vmatprep.subr.bf16.mxu0 %v1516_v20  ;;  %958 = vmatprep.subr.bf16.mxu1 %v1525_v23  ;;  %v796_v23 = vunpack.c.h.bf16 %v792_v7  ;;  %v1339_v7 = vld [vmem:[#allocation7 + $0xe8] ss:$16 sps:$4 sm:$0xff]  }
 0x544   :  { %918 = vmatpush1.bf16.msra.mxu0 %v1523_v22  ;;  %959 = vmatpush1.bf16.msra.mxu1 %v1531_v25 }
 0x545   :  { %919 = vmatprep.subr.bf16.mxu0 %v1528_v24  ;;  %960 = vmatprep.subr.bf16.mxu1 %v1537_v27 }
 0x548   :  { %920 = vmatpush1.bf16.msra.mxu0 %v1535_v26  ;;  %961 = vmatpush1.bf16.msra.mxu1 %v1543_v29 }
 0x549   :  { %921 = vmatprep.subr.bf16.mxu0 %v1540_v28  ;;  %962 = vmatprep.subr.bf16.mxu1 %v1549_v31 }
 0x54c   :  { %922 = vmatpush1.bf16.msra.mxu0 %v1547_v30  ;;  %963 = vmatpush1.bf16.msra.mxu1 %v1553_v32 }
 0x54d   :  { %1017 = vmatprep.subr.bf16.mxu0 %v1308_v2  ;;  %1058 = vmatprep.subr.bf16.mxu1 %v1309_v3  ;;  %v1335_v2 = vld [vmem:[#allocation7 + $0xc8] ss:$16 sps:$4 sm:$0xff]   ;;  %v1336_v3 = vld [vmem:[#allocation7 + $0xe4] ss:$16 sps:$4 sm:$0xff]  }
 0x602   :  { %v831_v9 = vpop.f32.mrb[20].mxu0  ;;  %v872_v10 = vpop.f32.mrb[20].mxu1 }
 0x603   :  { %v832_v11 = vadd.f32 %v831_v9, %v793_v6  ;;  %v833_v13 = vpop.f32.mrb[21].mxu0  ;;  %v874_v14 = vpop.f32.mrb[21].mxu1  ;;  %v873_v22 = vadd.f32 %v872_v10, %v795_v12  ;;  %v1338_v6 = vld [vmem:[#allocation7 + $0xe0] ss:$16 sps:$4 sm:$0xff]   ;;  %v902_v10 = vld [vmem:[#allocation4 + $0x68] sm:$0xff] }
 0x604   :  { %v834_v15 = vadd.f32 %v833_v13, %v794_v8  ;;  %v835_v16 = vpop.f32.mrb[22].mxu0  ;;  %v876_v17 = vpop.f32.mrb[22].mxu1  ;;  %v875_v24 = vadd.f32 %v874_v14, %v796_v23  ;;  %v901_v8 = vld [vmem:[#allocation4 + $0x60] sm:$0xff] }
 0x605   :  { %v879_v18 = vmul.f32 0.5, %v832_v11  ;;  %v836_v19 = vpop.f32.mrb[23].mxu0  ;;  %v877_v20 = vpop.f32.mrb[23].mxu1  ;;  %v903_v9 = vunpack.c.l.bf16 %v901_v8  ;;  %v904_v11 = vunpack.c.h.bf16 %v901_v8 }
 0x606   :  { %v883_v21 = vmul.f32 0.5, %v834_v15  ;;  %v888_v25 = vmul.f32 0.5, %v875_v24  ;;  %v905_v15 = vunpack.c.l.bf16 %v902_v10 }
 0x607   :  { %1278 = vtanh.f32 %v879_v18 }
 0x608   :  { %1280 = vtanh.f32 %v883_v21 }
 0x609   :  { %1282 = vtanh.f32 %v873_v22 }
 0x60a   :  { %1284 = vtanh.f32 %v888_v25 }
 0x611   :  { %v1279_v26 = vpop.eup %1278 }
 0x612   :  { %v1281_v27 = vpop.eup %1280  ;;  %v881_v28 = vmul.f32 0.5, %v1279_v26  ;;  %v906_v26 = vunpack.c.h.bf16 %v902_v10 }
 0x613   :  { %v885_v29 = vmul.f32 0.5, %v1281_v27  ;;  %v1283_v31 = vpop.eup %1282 }
 0x614   :  { %v882_v30 = vadd.f32 0.5, %v881_v28  ;;  %v1285_v35 = vpop.eup %1284 }
 0x615   :  { %v886_v32 = vadd.f32 0.5, %v885_v29  ;;  %v890_v36 = vmul.f32 0.5, %v1285_v35 }
 0x616   :  { %v893_v40 = vmul.f32 %v1283_v31, %v882_v30 }
 0x617   :  { %v892_v63 = vmul.f32 %v886_v32, %v1746_v57  ;;  %v891_v37 = vadd.f32 0.5, %v890_v36  ;;  %v1328_v57 = vld [vmem:[#allocation7 + $0xa4] ss:$16 sps:$4 sm:$0xff]  }
 0x619   :  { %v1782_v34 = vadd.f32 %v893_v40, %v892_v63 }
 0x61b   :  { %1286 = vtanh.f32 %v1782_v34 }
 0x625   :  { %v1287_v38 = vpop.eup %1286 }
 0x626   :  { %v896_v39 = vmul.f32 %v1287_v38, %v891_v37 }
 0x628   :  { %898 = vst [vmem:[#allocation9 + $0x28] sm:$0xff] %v896_v39  ;;  %v899_v41 = vpack.c.bf16 %v896_v39, %v896_v39 }
 0x62a   :  { %940 = vmatmul.mubr.bf16.vlgmr.msra.gmra.mrb[24].mxu0 %v899_v41  ;;  %981 = vmatmul.mubr.bf16.vlgmr.msra.gmra.mrb[24].mxu1 %v899_v41 }
 0x62b   :  { %1018 = vmatpush1.bf16.msra.mxu0 %v1310_v42  ;;  %1059 = vmatpush1.bf16.msra.mxu1 %v1311_v43 }
 0x62c   :  { %1019 = vmatprep.subr.bf16.mxu0 %v1312_v44  ;;  %1060 = vmatprep.subr.bf16.mxu1 %v1313_v45 }
 0x62d   :  { %1049 = vmatprep.mubr.bf16.mxu0 %v1416_v0  ;;  %1090 = vmatprep.mubr.bf16.mxu1 %v1416_v0  ;;  %v1324_v0 = vld [vmem:[#allocation7 + $0x84] ss:$16 sps:$4 sm:$0xff]  }
 0x62f   :  { %1020 = vmatpush1.bf16.msra.mxu0 %v1314_v1  ;;  %1061 = vmatpush1.bf16.msra.mxu1 %v1315_v4  ;;  %v1011_v1 = vld [vmem:[#allocation4 + $0x70] sm:$0xff] }
 0x630   :  { %1021 = vmatprep.subr.bf16.mxu0 %v1316_v46  ;;  %1062 = vmatprep.subr.bf16.mxu1 %v1317_v47  ;;  %v1013_v4 = vunpack.c.l.bf16 %v1011_v1  ;;  %v1012_v46 = vld [vmem:[#allocation4 + $0x78] sm:$0xff]  ;;  %v1014_v47 = vunpack.c.h.bf16 %v1011_v1 }
 0x633   :  { %1022 = vmatpush1.bf16.msra.mxu0 %v1318_v48  ;;  %1063 = vmatpush1.bf16.msra.mxu1 %v1319_v49 }
 0x634   :  { %1023 = vmatprep.subr.bf16.mxu0 %v1320_v50  ;;  %1064 = vmatprep.subr.bf16.mxu1 %v1321_v51  ;;  %v1015_v51 = vunpack.c.l.bf16 %v1012_v46 }
 0x637   :  { %1024 = vmatpush1.bf16.msra.mxu0 %v1322_v52  ;;  %1065 = vmatpush1.bf16.msra.mxu1 %v1323_v53 }
 0x638   :  { %1025 = vmatprep.subr.bf16.mxu0 %v1324_v0  ;;  %1066 = vmatprep.subr.bf16.mxu1 %v1325_v54 }
 0x63b   :  { %1026 = vmatpush1.bf16.msra.mxu0 %v1326_v55  ;;  %1067 = vmatpush1.bf16.msra.mxu1 %v1327_v56 }
 0x63c   :  { %1027 = vmatprep.subr.bf16.mxu0 %v1328_v57  ;;  %1068 = vmatprep.subr.bf16.mxu1 %v1329_v58 }
 0x63f   :  { %1028 = vmatpush1.bf16.msra.mxu0 %v1330_v33  ;;  %1069 = vmatpush1.bf16.msra.mxu1 %v1331_v59  ;;  %v1016_v59 = vunpack.c.h.bf16 %v1012_v46 }
 0x640   :  { %1029 = vmatprep.subr.bf16.mxu0 %v1332_v60  ;;  %1070 = vmatprep.subr.bf16.mxu1 %v1333_v61 }
 0x643   :  { %1030 = vmatpush1.bf16.msra.mxu0 %v1334_v62  ;;  %1071 = vmatpush1.bf16.msra.mxu1 %v1335_v2 }
 0x644   :  { %1031 = vmatprep.subr.bf16.mxu0 %v1336_v3  ;;  %1072 = vmatprep.subr.bf16.mxu1 %v1337_v5 }
 0x647   :  { %1032 = vmatpush1.bf16.msra.mxu0 %v1338_v6  ;;  %1073 = vmatpush1.bf16.msra.mxu1 %v1339_v7 }
 0x6fd   :  { %v941_v12 = vpop.f32.mrb[24].mxu0  ;;  %v982_v13 = vpop.f32.mrb[24].mxu1 }
 0x6fe   :  { %v942_v14 = vadd.f32 %v941_v12, %v903_v9  ;;  %v943_v16 = vpop.f32.mrb[25].mxu0  ;;  %v984_v17 = vpop.f32.mrb[25].mxu1  ;;  %v983_v25 = vadd.f32 %v982_v13, %v905_v15 }
 0x6ff   :  { %v944_v18 = vadd.f32 %v943_v16, %v904_v11  ;;  %v945_v19 = vpop.f32.mrb[26].mxu0  ;;  %v986_v20 = vpop.f32.mrb[26].mxu1  ;;  %v985_v27 = vadd.f32 %v984_v17, %v906_v26 }
 0x700   :  { %v989_v21 = vmul.f32 0.5, %v942_v14  ;;  %v946_v22 = vpop.f32.mrb[27].mxu0  ;;  %v987_v23 = vpop.f32.mrb[27].mxu1 }
 0x701   :  { %v993_v24 = vmul.f32 0.5, %v944_v18  ;;  %v998_v28 = vmul.f32 0.5, %v985_v27 }
 0x702   :  { %1288 = vtanh.f32 %v989_v21 }
 0x703   :  { %1290 = vtanh.f32 %v993_v24 }
 0x704   :  { %1292 = vtanh.f32 %v983_v25 }
 0x705   :  { %1294 = vtanh.f32 %v998_v28 }
 0x70c   :  { %v1289_v29 = vpop.eup %1288 }
 0x70d   :  { %v1291_v30 = vpop.eup %1290  ;;  %v991_v31 = vmul.f32 0.5, %v1289_v29 }
 0x70e   :  { %v995_v32 = vmul.f32 0.5, %v1291_v30  ;;  %v1293_v63 = vpop.eup %1292 }
 0x70f   :  { %v992_v40 = vadd.f32 0.5, %v991_v31  ;;  %v1295_v39 = vpop.eup %1294 }
 0x710   :  { %v996_v35 = vadd.f32 0.5, %v995_v32  ;;  %v1000_v41 = vmul.f32 0.5, %v1295_v39 }
 0x711   :  { %v1003_v36 = vmul.f32 %v1293_v63, %v992_v40 }
 0x712   :  { %v1002_v37 = vmul.f32 %v996_v35, %v1782_v34  ;;  %v1001_v42 = vadd.f32 0.5, %v1000_v41 }
 0x714   :  { %v1004_v38 = vadd.f32 %v1003_v36, %v1002_v37 }
 0x716   :  { %1296 = vtanh.f32 %v1004_v38 }
 0x720   :  { %v1297_v43 = vpop.eup %1296 }
 0x721   :  { %v1006_v44 = vmul.f32 %v1297_v43, %v1001_v42 }
 0x723   :  { %1008 = vst [vmem:[#allocation9 + $0x30] sm:$0xff] %v1006_v44  ;;  %v1009_v45 = vpack.c.bf16 %v1006_v44, %v1006_v44 }
 0x725   :  { %1050 = vmatmul.mubr.bf16.vlgmr.msra.gmra.mrb[28].mxu0 %v1009_v45  ;;  %1091 = vmatmul.mubr.bf16.vlgmr.msra.gmra.mrb[28].mxu1 %v1009_v45 }
 0x7f8   :  { %v1051_v48 = vpop.f32.mrb[28].mxu0  ;;  %v1092_v49 = vpop.f32.mrb[28].mxu1 }
 0x7f9   :  { %v1052_v50 = vadd.f32 %v1051_v48, %v1013_v4  ;;  %v1053_v34 = vpop.f32.mrb[29].mxu0  ;;  %v1094_v52 = vpop.f32.mrb[29].mxu1  ;;  %v1093_v33 = vadd.f32 %v1092_v49, %v1015_v51 }
 0x7fa   :  { %v1054_v53 = vadd.f32 %v1053_v34, %v1014_v47  ;;  %v1055_v0 = vpop.f32.mrb[30].mxu0  ;;  %v1096_v54 = vpop.f32.mrb[30].mxu1  ;;  %v1095_v60 = vadd.f32 %v1094_v52, %v1016_v59 }
 0x7fb   :  { %v1099_v55 = vmul.f32 0.5, %v1052_v50  ;;  %v1056_v56 = vpop.f32.mrb[31].mxu0  ;;  %v1097_v57 = vpop.f32.mrb[31].mxu1 }
 0x7fc   :  { %v1103_v58 = vmul.f32 0.5, %v1054_v53  ;;  %v1108_v61 = vmul.f32 0.5, %v1095_v60 }
 0x7fd   :  { %1298 = vtanh.f32 %v1099_v55 }
 0x7fe   :  { %1300 = vtanh.f32 %v1103_v58 }
 0x7ff   :  { %1302 = vtanh.f32 %v1093_v33 }
 0x800   :  { %1304 = vtanh.f32 %v1108_v61 }
 0x807   :  { %v1299_v62 = vpop.eup %1298 }
 0x808   :  { %v1301_v2 = vpop.eup %1300  ;;  %v1101_v3 = vmul.f32 0.5, %v1299_v62 }
 0x809   :  { %v1105_v5 = vmul.f32 0.5, %v1301_v2  ;;  %v1303_v7 = vpop.eup %1302 }
 0x80a   :  { %v1102_v6 = vadd.f32 0.5, %v1101_v3  ;;  %v1305_v12 = vpop.eup %1304 }
 0x80b   :  { %v1106_v8 = vadd.f32 0.5, %v1105_v5  ;;  %v1110_v13 = vmul.f32 0.5, %v1305_v12 }
 0x80c   :  { %v1113_v9 = vmul.f32 %v1303_v7, %v1102_v6 }
 0x80d   :  { %v1112_v10 = vmul.f32 %v1106_v8, %v1004_v38  ;;  %v1111_v14 = vadd.f32 0.5, %v1110_v13 }
 0x80f   :  { %v1114_v11 = vadd.f32 %v1113_v9, %v1112_v10 }
 0x811   :  { %1306 = vtanh.f32 %v1114_v11 }
 0x81b   :  { %v1307_v15 = vpop.eup %1306 }
 0x81c   :  { %v1116_v16 = vmul.f32 %v1307_v15, %v1111_v14 }
 0x81e   :  { %1118 = vst [vmem:[#allocation9 + $0x38] sm:$0xff] %v1116_v16 }
 0x81f   :  { %1395 = shalt.err (!%p1392_p6)
}
 0x820   :  { %s1396_s10 = scalar_lea.hbm %s1802_s2, 1024 }
 0x821   :  { %p1397_p7 = scmp.ne.s32.totalorder %s1802_s2, %s1396_s10  ;;  %p1400_p8 = scmp.lt.u32.totalorder %s1396_s10, %s1802_s2 }
 0x823   :  { %p1402_p9 = pnand %p1400_p8, %p1397_p7 }
 0x825   :  { %1405 = shalt.err (!%p1402_p9)
}
 0x826   :  { %s1419_s15 = smov 128   ;;  %s1420_s16 = smov 8  }
 0x827   :  { %1132 = dma.vmem_to_hbm [thread:$0]  %s1127_s6, 1024, %s1802_s2, [#allocation6], %s1419_s15, %s1419_s15, %s1420_s16  }
 0x828   :  { %1410 = dma.done.wait [#allocation6], 1024  }
 0x829   :  { %1411 = vsyncadd [#allocation6], 4294966272 }
 0x82a   :  { %1136 = vsyncpa [#allocation5], 1 }
 0x82b   :  { %1137 = vsyncpa [#allocation8], 1 }
 0x82c   :  { %1138 = vsyncpa [#allocation6], 1 }

</bundles_post_ra>
